<compile_context>
chip_gen: v7x
topology: tpu7x:2x2x1
jax: 0.10.0
libtpu: 0.0.40
codegen_flags: <defaults>
</compile_context>

<pallas_src>
import numpy as np
import jax
import jax.numpy as jnp
from jax.experimental import pallas as pl
from jax.experimental.pallas import tpu as pltpu

MNIST_MEAN = 0.1215
MNIST_STD = 0.3011
BN_EPS = 1e-5
LANE = 128          # padded lane width of every intermediate activation
NEG_BIG = -1e30     # bias for padded logit lanes (kills them in log_softmax)


def _round_up(x, m):
    return (x + m - 1) // m * m


# ----------------------------------------------------------------------------
# Fused Pallas kernel: whole forward pass, one invocation per batch tile.
# ----------------------------------------------------------------------------
def _fused_mnist_kernel(x_ref,
                        bp1_ref, r1_ref, bt1_ref,
                        bp2_ref, r2_ref, bt2_ref,
                        bp3_ref, r3_ref, bt3_ref,
                        scat_ref, w1_ref, b1_ref, w2_ref, b2_ref,
                        o_ref):
    f32 = jnp.float32
    bf16 = jnp.bfloat16

    def conv_pool_relu(h, bp_ref, r_ref, bt_ref):
        """VALID conv + 2x2 max-pool + bias + ReLU via banded MXU matmuls.

        h      : (rows, Lin) f32         NHWC-flattened activations (SSA value)
        bp_ref : (kh, Lin, 2*LANE) bf16  banded conv weights; the two 128-lane
                 halves carry the column offset (aw) of the pool window
        r_ref  : (2*Mp, rows-kh+1) bf16  0/1 row-pool selection; the two
                 stacked Mp-row halves carry the row offset (ah)
        bt_ref : (1, LANE) f32           conv bias tiled over pooled columns
        """
        kh = bp_ref.shape[0]
        m = h.shape[0] - kh + 1
        # kh back-to-back dots, no elementwise in between (lets v7x chain
        # accumulation in the MXU result buffer). f32 accumulation.
        acc = None
        for dh in range(kh):
            part = jnp.dot(h[dh:dh + m, :].astype(bf16), bp_ref[dh],
                           preferred_element_type=f32)
            acc = part if acc is None else acc + part
        # column half of the max-pool: vreg-aligned 128-lane halves.
        cols = jnp.maximum(acc[:, :LANE], acc[:, LANE:])
        # row half: ONE selection matmul, sublane-aligned max of the halves.
        sel = jnp.dot(r_ref[...], cols.astype(bf16), preferred_element_type=f32)
        mp = r_ref.shape[0] // 2
        pooled = jnp.maximum(sel[:mp, :], sel[mp:, :])
        # bias (commutes with max) + ReLU in f32; this layer's BatchNorm is
        # folded into the NEXT layer's weights host-side.
        return jnp.maximum(pooled + bt_ref[...], 0.0)

    h1 = conv_pool_relu(x_ref[...], bp1_ref, r1_ref, bt1_ref)   # (Mp1, 128)
    h2 = conv_pool_relu(h1, bp2_ref, r2_ref, bt2_ref)           # (Mp2, 128)
    h3 = conv_pool_relu(h2, bp3_ref, r3_ref, bt3_ref)           # (Mp3, 128)

    # Head: torch .view(N,-1) flatten + bn1 folded into w1.  One stacked
    # row-gather matmul pulls both pooled-row parities; they are laid side by
    # side along lanes so fc1 is a single 256-wide matmul.
    u = jnp.dot(scat_ref[...], h3.astype(bf16), preferred_element_type=f32)
    nbp = scat_ref.shape[0] // 2
    u2 = jnp.concatenate([u[:nbp, :], u[nbp:, :]], axis=1)       # (nbp, 256)
    z = jnp.dot(u2.astype(bf16), w1_ref[...], preferred_element_type=f32)
    z = jnp.maximum(z + b1_ref[...], 0.0)                        # (nbp, 128)
    logits = jnp.dot(z.astype(bf16), w2_ref[...],
                     preferred_element_type=f32) + b2_ref[...]   # (nbp, 128)
    # log_softmax, f32, lane-dense (padded lanes carry -1e30 bias).
    mx = jnp.max(logits, axis=-1, keepdims=True)
    lse = jnp.log(jnp.sum(jnp.exp(logits - mx), axis=-1, keepdims=True)) + mx
    out = logits - lse
    o_ref[...] = out[:o_ref.shape[0], :]


# ----------------------------------------------------------------------------
# Host-side parameter preparation (numpy, once, outside jit)
# ----------------------------------------------------------------------------
def prepare_kernel_params(p, batch, batch_tile=None):
    """Fold normalization / BatchNorm into adjacent weights and build the
    lane-padded banded-conv + stacked pooling-selection matrices (per batch
    tile) consumed by the fused kernel."""
    N = batch
    if batch_tile is None:
        batch_tile = N if N <= 64 else 64
    nb = batch_tile
    assert N % nb == 0
    if nb != N:
        # multi-step grid: every block must be (8,128)-aligned
        assert nb % 8 == 0 and (nb * 28) % 8 == 0
    npf = lambda a: np.asarray(a, np.float32)

    def fold_input_affine(w, b, scale, shift):
        # conv(x*scale[c] + shift[c]) == conv'(x) with folded weight/bias.
        w, b = npf(w), npf(b)
        scale, shift = npf(scale), npf(shift)
        return (w * scale[None, :, None, None],
                b + np.einsum('oihw,i->o', w, shift))

    def banded_pooled_weights(w, H, W, in_lanes):
        # (Cout,Cin,kh,kw) -> (kh, in_lanes, 2*LANE); the two 128-lane halves
        # fold the column offset (aw) of the 2x2 max-pool window.
        Cout, Cin, kh, kw = w.shape
        Hp, Wp = (H - kh + 1) // 2, (W - kw + 1) // 2
        assert W * Cin <= in_lanes and Wp * Cout <= LANE
        Bp = np.zeros((kh, in_lanes, 2 * LANE), np.float32)
        for dh in range(kh):
            for aw in range(2):
                for pw in range(Wp):
                    for dw in range(kw):
                        wi = 2 * pw + aw + dw
                        Bp[dh, wi * Cin:(wi + 1) * Cin,
                           aw * LANE + pw * Cout: aw * LANE + (pw + 1) * Cout] \
                            = w[:, :, dh, dw].T
        return Bp, Hp, Wp, Cout

    def row_pool_select(Hin, kh, rows_in):
        # (2*Mp, rows_in-kh+1); the two stacked Mp-row halves fold the row
        # offset (ah) of the pool window. Mp padded to a multiple of 8.
        Hp = (Hin - kh + 1) // 2
        m = rows_in - kh + 1
        Mp = _round_up(nb * Hp, 8)
        R = np.zeros((2 * Mp, m), np.float32)
        for ah in range(2):
            for n in range(nb):
                for ph in range(Hp):
                    R[ah * Mp + n * Hp + ph, n * Hin + 2 * ph + ah] = 1.0
        return R, Mp

    out = {}
    # conv1: fold the MNIST input normalization (Cin = 1).
    w1c, b1c = fold_input_affine(p['conv1_w'], p['conv1_b'],
                                 [1.0 / MNIST_STD], [-MNIST_MEAN / MNIST_STD])
    out['bp1'], Hp1, Wp1, C1 = banded_pooled_weights(w1c, 28, 28, 28)
    out['r1'], Mp1 = row_pool_select(28, w1c.shape[2], nb * 28)
    out['bt1'] = np.zeros((1, LANE), np.float32)
    out['bt1'][0, :Wp1 * C1] = np.tile(b1c, Wp1)

    # conv2: fold bn2d2 (applied to conv2's input).
    w2c, b2c = fold_input_affine(p['conv2_w'], p['conv2_b'],
                                 p['bn2d2_scale'], p['bn2d2_shift'])
    out['bp2'], Hp2, Wp2, C2 = banded_pooled_weights(w2c, Hp1, Wp1, LANE)
    out['r2'], Mp2 = row_pool_select(Hp1, w2c.shape[2], Mp1)
    out['bt2'] = np.zeros((1, LANE), np.float32)
    out['bt2'][0, :Wp2 * C2] = np.tile(b2c, Wp2)

    # conv3: fold bn2d3 (applied to conv3's input).
    w3c, b3c = fold_input_affine(p['conv3_w'], p['conv3_b'],
                                 p['bn2d3_scale'], p['bn2d3_shift'])
    out['bp3'], Hp3, Wp3, C3 = banded_pooled_weights(w3c, Hp2, Wp2, LANE)
    out['r3'], Mp3 = row_pool_select(Hp2, w3c.shape[2], Mp2)
    out['bt3'] = np.zeros((1, LANE), np.float32)
    out['bt3'][0, :Wp3 * C3] = np.tile(b3c, Wp3)

    # Head row-gather: one stacked selection matrix over pooled-row parity ph.
    nbp = _round_up(nb, 8)
    S = np.zeros((2 * nbp, Mp3), np.float32)
    for ph in range(Hp3):                      # Hp3 == 2
        for n in range(nb):
            S[ph * nbp + n, n * Hp3 + ph] = 1.0
    out['scat'] = S

    # fc1: fold bn1 + the torch NCHW flatten permutation; the two ph halves go
    # along the 256-lane contraction dim to match the in-kernel lane concat.
    s1, t1 = npf(p['bn1_scale']), npf(p['bn1_shift'])
    w1_raw = npf(p['fc1_w'])                       # (160, 100) = (in, out)
    w1f = w1_raw * s1[:, None]
    b1f = npf(p['fc1_b']) + t1 @ w1_raw
    H1 = w1f.shape[1]
    assert w1f.shape[0] == C3 * Hp3 * Wp3 and H1 <= LANE
    W1cat = np.zeros((2 * LANE, LANE), np.float32)
    for ph in range(Hp3):
        for co in range(C3):
            for pw in range(Wp3):
                W1cat[ph * LANE + pw * C3 + co, :H1] = \
                    w1f[co * Hp3 * Wp3 + ph * Wp3 + pw, :]
    out['w1cat'] = W1cat
    b1p = np.zeros((1, LANE), np.float32)
    b1p[0, :H1] = b1f
    out['b1'] = b1p

    # fc2: fold bn2; zero-pad logits 10 -> 128 lanes (padded lanes get a -1e30
    # bias so they never affect the f32 log_softmax reduction).
    s2, t2 = npf(p['bn2_scale']), npf(p['bn2_shift'])
    w2_raw = npf(p['fc2_w'])                       # (100, 10)
    w2f = w2_raw * s2[:, None]
    b2f = npf(p['fc2_b']) + t2 @ w2_raw
    w2p = np.zeros((LANE, LANE), np.float32)
    w2p[:w2f.shape[0], :w2f.shape[1]] = w2f
    b2p = np.full((1, LANE), NEG_BIG, np.float32)
    b2p[0, :w2f.shape[1]] = b2f
    out['w2p'] = w2p
    out['b2p'] = b2p

    # bf16 for everything that feeds the MXU; biases stay f32.
    bf16_keys = {'bp1', 'r1', 'bp2', 'r2', 'bp3', 'r3', 'scat', 'w1cat', 'w2p'}
    return {k: jnp.asarray(v, jnp.bfloat16 if k in bf16_keys else jnp.float32)
            for k, v in out.items()}


# ----------------------------------------------------------------------------
# Forward wrapper (one pallas_call, batch tiled over a "parallel" grid)
# ----------------------------------------------------------------------------
def solution_model_forward(x, kp, num_classes=10):
    """x: (N, 1, 28, 28) float NCHW MNIST batch -> (N, 10) log-probabilities."""
    N, _, H, W = x.shape
    # Batch tile baked into the prepared selection matrices.
    kh1 = kp['bp1'].shape[0]
    nb = (kp['r1'].shape[1] + kh1 - 1) // H
    assert N % nb == 0, "batch size must be a multiple of the prepared batch tile"
    x2d = x.astype(jnp.float32).reshape(N * H, W)     # NHWC-flattened (Cin=1)
    lanes = kp['b2p'].shape[1]
    grid = (N // nb,)

    def w_spec(arr):
        nd = arr.ndim
        return pl.BlockSpec(arr.shape, lambda b, _n=nd: (0,) * _n)

    weight_names = ['bp1', 'r1', 'bt1', 'bp2', 'r2', 'bt2',
                    'bp3', 'r3', 'bt3', 'scat', 'w1cat', 'b1', 'w2p', 'b2p']
    in_specs = ([pl.BlockSpec((nb * H, W), lambda b: (b, 0))]
                + [w_spec(kp[k]) for k in weight_names])
    out_specs = pl.BlockSpec((nb, lanes), lambda b: (b, 0))

    out = pl.pallas_call(
        _fused_mnist_kernel,
        out_shape=jax.ShapeDtypeStruct((N, lanes), jnp.float32),
        grid=grid,
        in_specs=in_specs,
        out_specs=out_specs,
        compiler_params=pltpu.CompilerParams(
            dimension_semantics=("parallel",)),
    )(x2d, *[kp[k] for k in weight_names])
    return out[:, :num_classes]


# ----------------------------------------------------------------------------
# Deterministic parameter initialization (shapes from SolutionModel.__init__)
# ----------------------------------------------------------------------------
def init_params(key):
    ks = jax.random.split(key, 10)

    def u(k, shape, fan_in):
        bound = 1.0 / np.sqrt(fan_in)
        return jax.random.uniform(k, shape, jnp.float32, -bound, bound)

    p = {}
    p['conv1_w'] = u(ks[0], (5, 1, 3, 3), 1 * 9)
    p['conv1_b'] = u(ks[1], (5,), 1 * 9)
    p['conv2_w'] = u(ks[2], (20, 5, 3, 3), 5 * 9)
    p['conv2_b'] = u(ks[3], (20,), 5 * 9)
    p['conv3_w'] = u(ks[4], (40, 20, 2, 2), 20 * 4)
    p['conv3_b'] = u(ks[5], (40,), 20 * 4)
    p['fc1_w'] = u(ks[6], (160, 100), 160)   # stored (in, out)
    p['fc1_b'] = u(ks[7], (100,), 160)
    p['fc2_w'] = u(ks[8], (100, 10), 100)
    p['fc2_b'] = u(ks[9], (10,), 100)
    # BatchNorm default params + running stats, folded to scale/shift.
    for name, n in [('bn2d2', 5), ('bn2d3', 20), ('bn1', 160), ('bn2', 100)]:
        gamma = jnp.ones((n,), jnp.float32)
        beta = jnp.zeros((n,), jnp.float32)
        mean = jnp.zeros((n,), jnp.float32)
        var = jnp.ones((n,), jnp.float32)
        scale = gamma / jnp.sqrt(var + BN_EPS)
        p[f'{name}_scale'] = scale
        p[f'{name}_shift'] = beta - mean * scale
    return p


# ----------------------------------------------------------------------------
# Pure-JAX f32 reference (for the correctness check)
# ----------------------------------------------------------------------------
def reference_forward(x, p):
    def conv(h, w, b):
        y = jax.lax.conv_general_dilated(
            h, w, (1, 1), 'VALID', dimension_numbers=('NCHW', 'OIHW', 'NCHW'))
        return y + b.reshape(1, -1, 1, 1)

    def maxpool2(h):
        return jax.lax.reduce_window(h, -jnp.inf, jax.lax.max,
                                     (1, 1, 2, 2), (1, 1, 2, 2), 'VALID')

    def bn(h, s, t):
        if h.ndim == 4:
            return h * s.reshape(1, -1, 1, 1) + t.reshape(1, -1, 1, 1)
        return h * s.reshape(1, -1) + t.reshape(1, -1)

    h = (x - MNIST_MEAN) / MNIST_STD
    h = jax.nn.relu(maxpool2(conv(h, p['conv1_w'], p['conv1_b'])))
    h = bn(h, p['bn2d2_scale'], p['bn2d2_shift'])
    h = jax.nn.relu(maxpool2(conv(h, p['conv2_w'], p['conv2_b'])))
    h = bn(h, p['bn2d3_scale'], p['bn2d3_shift'])
    h = jax.nn.relu(maxpool2(conv(h, p['conv3_w'], p['conv3_b'])))
    h = h.reshape(h.shape[0], -1)
    h = bn(h, p['bn1_scale'], p['bn1_shift'])
    h = jax.nn.relu(h @ p['fc1_w'] + p['fc1_b'])
    h = bn(h, p['bn2_scale'], p['bn2_shift'])
    logits = h @ p['fc2_w'] + p['fc2_b']
    return jax.nn.log_softmax(logits, axis=1)


if __name__ == "__main__":
    key = jax.random.PRNGKey(0)
    pkey, xkey = jax.random.split(key)
    params = init_params(pkey)

    # MNIST-shaped input (28x28 is required by the 160-feature flatten).
    N = 2
    x = jax.random.uniform(xkey, (N, 1, 28, 28), jnp.float32)

    kparams = prepare_kernel_params(params, N)
    fwd = jax.jit(solution_model_forward)
    out = jax.block_until_ready(fwd(x, kparams))
    assert out.shape == (N, 10)
    assert bool(jnp.all(jnp.isfinite(out)))

    ref = reference_forward(x, params)
    err = float(jnp.max(jnp.abs(out - ref)))
    # bf16 MXU operands (per perf review) vs f32 reference: loosened tolerance.
    if err > 5e-2:
        raise AssertionError(f"Pallas output mismatch vs reference, max abs err = {err}")

    print("KERNEL_OK")
</pallas_src>

<mosaic_0001>
module attributes {stable_mosaic.version = 11 : i64} {
  func.func @_fused_mnist_kernel(%arg0: i32, %arg1: memref<56x28xf32, #tpu.memory_space<vmem>>, %arg2: memref<3x28x256xbf16, #tpu.memory_space<vmem>>, %arg3: memref<64x54xbf16, #tpu.memory_space<vmem>>, %arg4: memref<1x128xf32, #tpu.memory_space<vmem>>, %arg5: memref<3x128x256xbf16, #tpu.memory_space<vmem>>, %arg6: memref<32x30xbf16, #tpu.memory_space<vmem>>, %arg7: memref<1x128xf32, #tpu.memory_space<vmem>>, %arg8: memref<2x128x256xbf16, #tpu.memory_space<vmem>>, %arg9: memref<16x15xbf16, #tpu.memory_space<vmem>>, %arg10: memref<1x128xf32, #tpu.memory_space<vmem>>, %arg11: memref<16x8xbf16, #tpu.memory_space<vmem>>, %arg12: memref<256x128xbf16, #tpu.memory_space<vmem>>, %arg13: memref<1x128xf32, #tpu.memory_space<vmem>>, %arg14: memref<128x128xbf16, #tpu.memory_space<vmem>>, %arg15: memref<1x128xf32, #tpu.memory_space<vmem>>, %arg16: memref<2x128xf32, #tpu.memory_space<vmem>>) attributes {dimension_semantics = [#tpu.dimension_semantics<parallel>], iteration_bounds = array<i64: 1>, scalar_prefetch = 0 : i64, scratch_operands = 0 : i64, tpu.core_type = #tpu.core_type<tc>, window_params = [{transform_indices = @transform_0, window_bounds = array<i64: 56, 28>}, {pipeline_mode = #tpu.pipeline_mode<synchronous>, transform_indices = @transform_1, window_bounds = array<i64: 3, 28, 256>}, {pipeline_mode = #tpu.pipeline_mode<synchronous>, transform_indices = @transform_2, window_bounds = array<i64: 64, 54>}, {pipeline_mode = #tpu.pipeline_mode<synchronous>, transform_indices = @transform_3, window_bounds = array<i64: 1, 128>}, {pipeline_mode = #tpu.pipeline_mode<synchronous>, transform_indices = @transform_4, window_bounds = array<i64: 3, 128, 256>}, {pipeline_mode = #tpu.pipeline_mode<synchronous>, transform_indices = @transform_5, window_bounds = array<i64: 32, 30>}, {pipeline_mode = #tpu.pipeline_mode<synchronous>, transform_indices = @transform_6, window_bounds = array<i64: 1, 128>}, {pipeline_mode = #tpu.pipeline_mode<synchronous>, transform_indices = @transform_7, window_bounds = array<i64: 2, 128, 256>}, {pipeline_mode = #tpu.pipeline_mode<synchronous>, transform_indices = @transform_8, window_bounds = array<i64: 16, 15>}, {pipeline_mode = #tpu.pipeline_mode<synchronous>, transform_indices = @transform_9, window_bounds = array<i64: 1, 128>}, {pipeline_mode = #tpu.pipeline_mode<synchronous>, transform_indices = @transform_10, window_bounds = array<i64: 16, 8>}, {pipeline_mode = #tpu.pipeline_mode<synchronous>, transform_indices = @transform_11, window_bounds = array<i64: 256, 128>}, {pipeline_mode = #tpu.pipeline_mode<synchronous>, transform_indices = @transform_12, window_bounds = array<i64: 1, 128>}, {pipeline_mode = #tpu.pipeline_mode<synchronous>, transform_indices = @transform_13, window_bounds = array<i64: 128, 128>}, {pipeline_mode = #tpu.pipeline_mode<synchronous>, transform_indices = @transform_14, window_bounds = array<i64: 1, 128>}, {transform_indices = @transform_15, window_bounds = array<i64: 2, 128>}]} {
    %c0 = arith.constant 0 : index
    %c0_0 = arith.constant 0 : index
    %0 = vector.load %arg1[%c0, %c0_0] : memref<56x28xf32, #tpu.memory_space<vmem>>, vector<56x28xf32>
    %1 = vector.extract_strided_slice %0 {offsets = [0, 0], sizes = [54, 28], strides = [1, 1]} : vector<56x28xf32> to vector<54x28xf32>
    %2 = arith.truncf %1 : vector<54x28xf32> to vector<54x28xbf16>
    %c0_1 = arith.constant 0 : index
    %c0_2 = arith.constant 0 : index
    %c0_3 = arith.constant 0 : index
    %3 = vector.load %arg2[%c0_1, %c0_2, %c0_3] : memref<3x28x256xbf16, #tpu.memory_space<vmem>>, vector<1x28x256xbf16>
    %4 = vector.shape_cast %3 : vector<1x28x256xbf16> to vector<28x256xbf16>
    %cst = arith.constant dense<0.000000e+00> : vector<54x256xf32>
    %5 = tpu.matmul %2, %4, %cst {dimension_numbers = #tpu.dot_dimension_numbers<[1], [0], [0], [1], [0, 0, 1, 1], [], []>} : vector<54x28xbf16>, vector<28x256xbf16>, vector<54x256xf32> -> vector<54x256xf32>
    %6 = vector.extract_strided_slice %0 {offsets = [1, 0], sizes = [54, 28], strides = [1, 1]} : vector<56x28xf32> to vector<54x28xf32>
    %7 = arith.truncf %6 : vector<54x28xf32> to vector<54x28xbf16>
    %c1 = arith.constant 1 : index
    %c0_4 = arith.constant 0 : index
    %c0_5 = arith.constant 0 : index
    %8 = vector.load %arg2[%c1, %c0_4, %c0_5] : memref<3x28x256xbf16, #tpu.memory_space<vmem>>, vector<1x28x256xbf16>
    %9 = vector.shape_cast %8 : vector<1x28x256xbf16> to vector<28x256xbf16>
    %cst_6 = arith.constant dense<0.000000e+00> : vector<54x256xf32>
    %10 = tpu.matmul %7, %9, %cst_6 {dimension_numbers = #tpu.dot_dimension_numbers<[1], [0], [0], [1], [0, 0, 1, 1], [], []>} : vector<54x28xbf16>, vector<28x256xbf16>, vector<54x256xf32> -> vector<54x256xf32>
    %11 = arith.addf %5, %10 : vector<54x256xf32>
    %12 = vector.extract_strided_slice %0 {offsets = [2, 0], sizes = [54, 28], strides = [1, 1]} : vector<56x28xf32> to vector<54x28xf32>
    %13 = arith.truncf %12 : vector<54x28xf32> to vector<54x28xbf16>
    %c2 = arith.constant 2 : index
    %c0_7 = arith.constant 0 : index
    %c0_8 = arith.constant 0 : index
    %14 = vector.load %arg2[%c2, %c0_7, %c0_8] : memref<3x28x256xbf16, #tpu.memory_space<vmem>>, vector<1x28x256xbf16>
    %15 = vector.shape_cast %14 : vector<1x28x256xbf16> to vector<28x256xbf16>
    %cst_9 = arith.constant dense<0.000000e+00> : vector<54x256xf32>
    %16 = tpu.matmul %13, %15, %cst_9 {dimension_numbers = #tpu.dot_dimension_numbers<[1], [0], [0], [1], [0, 0, 1, 1], [], []>} : vector<54x28xbf16>, vector<28x256xbf16>, vector<54x256xf32> -> vector<54x256xf32>
    %17 = arith.addf %11, %16 : vector<54x256xf32>
    %18 = vector.extract_strided_slice %17 {offsets = [0, 0], sizes = [54, 128], strides = [1, 1]} : vector<54x256xf32> to vector<54x128xf32>
    %19 = vector.extract_strided_slice %17 {offsets = [0, 128], sizes = [54, 128], strides = [1, 1]} : vector<54x256xf32> to vector<54x128xf32>
    %20 = arith.maximumf %18, %19 : vector<54x128xf32>
    %c0_10 = arith.constant 0 : index
    %c0_11 = arith.constant 0 : index
    %21 = vector.load %arg3[%c0_10, %c0_11] : memref<64x54xbf16, #tpu.memory_space<vmem>>, vector<64x54xbf16>
    %22 = arith.truncf %20 : vector<54x128xf32> to vector<54x128xbf16>
    %cst_12 = arith.constant dense<0.000000e+00> : vector<64x128xf32>
    %23 = tpu.matmul %21, %22, %cst_12 {dimension_numbers = #tpu.dot_dimension_numbers<[1], [0], [0], [1], [0, 0, 1, 1], [], []>} : vector<64x54xbf16>, vector<54x128xbf16>, vector<64x128xf32> -> vector<64x128xf32>
    %24 = vector.extract_strided_slice %23 {offsets = [0, 0], sizes = [32, 128], strides = [1, 1]} : vector<64x128xf32> to vector<32x128xf32>
    %25 = vector.extract_strided_slice %23 {offsets = [32, 0], sizes = [32, 128], strides = [1, 1]} : vector<64x128xf32> to vector<32x128xf32>
    %26 = arith.maximumf %24, %25 : vector<32x128xf32>
    %c0_13 = arith.constant 0 : index
    %c0_14 = arith.constant 0 : index
    %27 = vector.load %arg4[%c0_13, %c0_14] : memref<1x128xf32, #tpu.memory_space<vmem>>, vector<1x128xf32>
    %28 = vector.broadcast %27 : vector<1x128xf32> to vector<32x128xf32>
    %29 = arith.addf %26, %28 : vector<32x128xf32>
    %cst_15 = arith.constant 0.000000e+00 : f32
    %30 = vector.broadcast %cst_15 : f32 to vector<32x128xf32>
    %31 = arith.maximumf %29, %30 : vector<32x128xf32>
    %32 = vector.extract_strided_slice %31 {offsets = [0, 0], sizes = [30, 128], strides = [1, 1]} : vector<32x128xf32> to vector<30x128xf32>
    %33 = arith.truncf %32 : vector<30x128xf32> to vector<30x128xbf16>
    %c0_16 = arith.constant 0 : index
    %c0_17 = arith.constant 0 : index
    %c0_18 = arith.constant 0 : index
    %34 = vector.load %arg5[%c0_16, %c0_17, %c0_18] : memref<3x128x256xbf16, #tpu.memory_space<vmem>>, vector<1x128x256xbf16>
    %35 = vector.shape_cast %34 : vector<1x128x256xbf16> to vector<128x256xbf16>
    %cst_19 = arith.constant dense<0.000000e+00> : vector<30x256xf32>
    %36 = tpu.matmul %33, %35, %cst_19 {dimension_numbers = #tpu.dot_dimension_numbers<[1], [0], [0], [1], [0, 0, 1, 1], [], []>} : vector<30x128xbf16>, vector<128x256xbf16>, vector<30x256xf32> -> vector<30x256xf32>
    %37 = vector.extract_strided_slice %31 {offsets = [1, 0], sizes = [30, 128], strides = [1, 1]} : vector<32x128xf32> to vector<30x128xf32>
    %38 = arith.truncf %37 : vector<30x128xf32> to vector<30x128xbf16>
    %c1_20 = arith.constant 1 : index
    %c0_21 = arith.constant 0 : index
    %c0_22 = arith.constant 0 : index
    %39 = vector.load %arg5[%c1_20, %c0_21, %c0_22] : memref<3x128x256xbf16, #tpu.memory_space<vmem>>, vector<1x128x256xbf16>
    %40 = vector.shape_cast %39 : vector<1x128x256xbf16> to vector<128x256xbf16>
    %cst_23 = arith.constant dense<0.000000e+00> : vector<30x256xf32>
    %41 = tpu.matmul %38, %40, %cst_23 {dimension_numbers = #tpu.dot_dimension_numbers<[1], [0], [0], [1], [0, 0, 1, 1], [], []>} : vector<30x128xbf16>, vector<128x256xbf16>, vector<30x256xf32> -> vector<30x256xf32>
    %42 = arith.addf %36, %41 : vector<30x256xf32>
    %43 = vector.extract_strided_slice %31 {offsets = [2, 0], sizes = [30, 128], strides = [1, 1]} : vector<32x128xf32> to vector<30x128xf32>
    %44 = arith.truncf %43 : vector<30x128xf32> to vector<30x128xbf16>
    %c2_24 = arith.constant 2 : index
    %c0_25 = arith.constant 0 : index
    %c0_26 = arith.constant 0 : index
    %45 = vector.load %arg5[%c2_24, %c0_25, %c0_26] : memref<3x128x256xbf16, #tpu.memory_space<vmem>>, vector<1x128x256xbf16>
    %46 = vector.shape_cast %45 : vector<1x128x256xbf16> to vector<128x256xbf16>
    %cst_27 = arith.constant dense<0.000000e+00> : vector<30x256xf32>
    %47 = tpu.matmul %44, %46, %cst_27 {dimension_numbers = #tpu.dot_dimension_numbers<[1], [0], [0], [1], [0, 0, 1, 1], [], []>} : vector<30x128xbf16>, vector<128x256xbf16>, vector<30x256xf32> -> vector<30x256xf32>
    %48 = arith.addf %42, %47 : vector<30x256xf32>
    %49 = vector.extract_strided_slice %48 {offsets = [0, 0], sizes = [30, 128], strides = [1, 1]} : vector<30x256xf32> to vector<30x128xf32>
    %50 = vector.extract_strided_slice %48 {offsets = [0, 128], sizes = [30, 128], strides = [1, 1]} : vector<30x256xf32> to vector<30x128xf32>
    %51 = arith.maximumf %49, %50 : vector<30x128xf32>
    %c0_28 = arith.constant 0 : index
    %c0_29 = arith.constant 0 : index
    %52 = vector.load %arg6[%c0_28, %c0_29] : memref<32x30xbf16, #tpu.memory_space<vmem>>, vector<32x30xbf16>
    %53 = arith.truncf %51 : vector<30x128xf32> to vector<30x128xbf16>
    %cst_30 = arith.constant dense<0.000000e+00> : vector<32x128xf32>
    %54 = tpu.matmul %52, %53, %cst_30 {dimension_numbers = #tpu.dot_dimension_numbers<[1], [0], [0], [1], [0, 0, 1, 1], [], []>} : vector<32x30xbf16>, vector<30x128xbf16>, vector<32x128xf32> -> vector<32x128xf32>
    %55 = vector.extract_strided_slice %54 {offsets = [0, 0], sizes = [16, 128], strides = [1, 1]} : vector<32x128xf32> to vector<16x128xf32>
    %56 = vector.extract_strided_slice %54 {offsets = [16, 0], sizes = [16, 128], strides = [1, 1]} : vector<32x128xf32> to vector<16x128xf32>
    %57 = arith.maximumf %55, %56 : vector<16x128xf32>
    %c0_31 = arith.constant 0 : index
    %c0_32 = arith.constant 0 : index
    %58 = vector.load %arg7[%c0_31, %c0_32] : memref<1x128xf32, #tpu.memory_space<vmem>>, vector<1x128xf32>
    %59 = vector.broadcast %58 : vector<1x128xf32> to vector<16x128xf32>
    %60 = arith.addf %57, %59 : vector<16x128xf32>
    %cst_33 = arith.constant 0.000000e+00 : f32
    %61 = vector.broadcast %cst_33 : f32 to vector<16x128xf32>
    %62 = arith.maximumf %60, %61 : vector<16x128xf32>
    %63 = vector.extract_strided_slice %62 {offsets = [0, 0], sizes = [15, 128], strides = [1, 1]} : vector<16x128xf32> to vector<15x128xf32>
    %64 = arith.truncf %63 : vector<15x128xf32> to vector<15x128xbf16>
    %c0_34 = arith.constant 0 : index
    %c0_35 = arith.constant 0 : index
    %c0_36 = arith.constant 0 : index
    %65 = vector.load %arg8[%c0_34, %c0_35, %c0_36] : memref<2x128x256xbf16, #tpu.memory_space<vmem>>, vector<1x128x256xbf16>
    %66 = vector.shape_cast %65 : vector<1x128x256xbf16> to vector<128x256xbf16>
    %cst_37 = arith.constant dense<0.000000e+00> : vector<15x256xf32>
    %67 = tpu.matmul %64, %66, %cst_37 {dimension_numbers = #tpu.dot_dimension_numbers<[1], [0], [0], [1], [0, 0, 1, 1], [], []>} : vector<15x128xbf16>, vector<128x256xbf16>, vector<15x256xf32> -> vector<15x256xf32>
    %68 = vector.extract_strided_slice %62 {offsets = [1, 0], sizes = [15, 128], strides = [1, 1]} : vector<16x128xf32> to vector<15x128xf32>
    %69 = arith.truncf %68 : vector<15x128xf32> to vector<15x128xbf16>
    %c1_38 = arith.constant 1 : index
    %c0_39 = arith.constant 0 : index
    %c0_40 = arith.constant 0 : index
    %70 = vector.load %arg8[%c1_38, %c0_39, %c0_40] : memref<2x128x256xbf16, #tpu.memory_space<vmem>>, vector<1x128x256xbf16>
    %71 = vector.shape_cast %70 : vector<1x128x256xbf16> to vector<128x256xbf16>
    %cst_41 = arith.constant dense<0.000000e+00> : vector<15x256xf32>
    %72 = tpu.matmul %69, %71, %cst_41 {dimension_numbers = #tpu.dot_dimension_numbers<[1], [0], [0], [1], [0, 0, 1, 1], [], []>} : vector<15x128xbf16>, vector<128x256xbf16>, vector<15x256xf32> -> vector<15x256xf32>
    %73 = arith.addf %67, %72 : vector<15x256xf32>
    %74 = vector.extract_strided_slice %73 {offsets = [0, 0], sizes = [15, 128], strides = [1, 1]} : vector<15x256xf32> to vector<15x128xf32>
    %75 = vector.extract_strided_slice %73 {offsets = [0, 128], sizes = [15, 128], strides = [1, 1]} : vector<15x256xf32> to vector<15x128xf32>
    %76 = arith.maximumf %74, %75 : vector<15x128xf32>
    %c0_42 = arith.constant 0 : index
    %c0_43 = arith.constant 0 : index
    %77 = vector.load %arg9[%c0_42, %c0_43] : memref<16x15xbf16, #tpu.memory_space<vmem>>, vector<16x15xbf16>
    %78 = arith.truncf %76 : vector<15x128xf32> to vector<15x128xbf16>
    %cst_44 = arith.constant dense<0.000000e+00> : vector<16x128xf32>
    %79 = tpu.matmul %77, %78, %cst_44 {dimension_numbers = #tpu.dot_dimension_numbers<[1], [0], [0], [1], [0, 0, 1, 1], [], []>} : vector<16x15xbf16>, vector<15x128xbf16>, vector<16x128xf32> -> vector<16x128xf32>
    %80 = vector.extract_strided_slice %79 {offsets = [0, 0], sizes = [8, 128], strides = [1, 1]} : vector<16x128xf32> to vector<8x128xf32>
    %81 = vector.extract_strided_slice %79 {offsets = [8, 0], sizes = [8, 128], strides = [1, 1]} : vector<16x128xf32> to vector<8x128xf32>
    %82 = arith.maximumf %80, %81 : vector<8x128xf32>
    %c0_45 = arith.constant 0 : index
    %c0_46 = arith.constant 0 : index
    %83 = vector.load %arg10[%c0_45, %c0_46] : memref<1x128xf32, #tpu.memory_space<vmem>>, vector<1x128xf32>
    %84 = vector.broadcast %83 : vector<1x128xf32> to vector<8x128xf32>
    %85 = arith.addf %82, %84 : vector<8x128xf32>
    %cst_47 = arith.constant 0.000000e+00 : f32
    %86 = vector.broadcast %cst_47 : f32 to vector<8x128xf32>
    %87 = arith.maximumf %85, %86 : vector<8x128xf32>
    %c0_48 = arith.constant 0 : index
    %c0_49 = arith.constant 0 : index
    %88 = vector.load %arg11[%c0_48, %c0_49] : memref<16x8xbf16, #tpu.memory_space<vmem>>, vector<16x8xbf16>
    %89 = arith.truncf %87 : vector<8x128xf32> to vector<8x128xbf16>
    %cst_50 = arith.constant dense<0.000000e+00> : vector<16x128xf32>
    %90 = tpu.matmul %88, %89, %cst_50 {dimension_numbers = #tpu.dot_dimension_numbers<[1], [0], [0], [1], [0, 0, 1, 1], [], []>} : vector<16x8xbf16>, vector<8x128xbf16>, vector<16x128xf32> -> vector<16x128xf32>
    %91 = vector.extract_strided_slice %90 {offsets = [0, 0], sizes = [8, 128], strides = [1, 1]} : vector<16x128xf32> to vector<8x128xf32>
    %92 = vector.extract_strided_slice %90 {offsets = [8, 0], sizes = [8, 128], strides = [1, 1]} : vector<16x128xf32> to vector<8x128xf32>
    %93 = tpu.concatenate %91, %92 in 1 : vector<8x128xf32>, vector<8x128xf32> -> vector<8x256xf32>
    %94 = arith.truncf %93 : vector<8x256xf32> to vector<8x256xbf16>
    %c0_51 = arith.constant 0 : index
    %c0_52 = arith.constant 0 : index
    %95 = vector.load %arg12[%c0_51, %c0_52] : memref<256x128xbf16, #tpu.memory_space<vmem>>, vector<256x128xbf16>
    %cst_53 = arith.constant dense<0.000000e+00> : vector<8x128xf32>
    %96 = tpu.matmul %94, %95, %cst_53 {dimension_numbers = #tpu.dot_dimension_numbers<[1], [0], [0], [1], [0, 0, 1, 1], [], []>} : vector<8x256xbf16>, vector<256x128xbf16>, vector<8x128xf32> -> vector<8x128xf32>
    %c0_54 = arith.constant 0 : index
    %c0_55 = arith.constant 0 : index
    %97 = vector.load %arg13[%c0_54, %c0_55] : memref<1x128xf32, #tpu.memory_space<vmem>>, vector<1x128xf32>
    %98 = vector.broadcast %97 : vector<1x128xf32> to vector<8x128xf32>
    %99 = arith.addf %96, %98 : vector<8x128xf32>
    %cst_56 = arith.constant 0.000000e+00 : f32
    %100 = vector.broadcast %cst_56 : f32 to vector<8x128xf32>
    %101 = arith.maximumf %99, %100 : vector<8x128xf32>
    %102 = arith.truncf %101 : vector<8x128xf32> to vector<8x128xbf16>
    %c0_57 = arith.constant 0 : index
    %c0_58 = arith.constant 0 : index
    %103 = vector.load %arg14[%c0_57, %c0_58] : memref<128x128xbf16, #tpu.memory_space<vmem>>, vector<128x128xbf16>
    %cst_59 = arith.constant dense<0.000000e+00> : vector<8x128xf32>
    %104 = tpu.matmul %102, %103, %cst_59 {dimension_numbers = #tpu.dot_dimension_numbers<[1], [0], [0], [1], [0, 0, 1, 1], [], []>} : vector<8x128xbf16>, vector<128x128xbf16>, vector<8x128xf32> -> vector<8x128xf32>
    %c0_60 = arith.constant 0 : index
    %c0_61 = arith.constant 0 : index
    %105 = vector.load %arg15[%c0_60, %c0_61] : memref<1x128xf32, #tpu.memory_space<vmem>>, vector<1x128xf32>
    %106 = vector.broadcast %105 : vector<1x128xf32> to vector<8x128xf32>
    %107 = arith.addf %104, %106 : vector<8x128xf32>
    %cst_62 = arith.constant dense<0xFF800000> : vector<8xf32>
    %108 = vector.multi_reduction <maximumf>, %107, %cst_62 [1] : vector<8x128xf32> to vector<8xf32>
    %109 = vector.shape_cast %108 : vector<8xf32> to vector<8x1xf32>
    %110 = vector.broadcast %109 : vector<8x1xf32> to vector<8x128xf32>
    %111 = arith.subf %107, %110 : vector<8x128xf32>
    %112 = math.exp %111 : vector<8x128xf32>
    %cst_63 = arith.constant dense<0.000000e+00> : vector<8xf32>
    %113 = vector.multi_reduction <add>, %112, %cst_63 [1] : vector<8x128xf32> to vector<8xf32>
    %114 = vector.shape_cast %113 : vector<8xf32> to vector<8x1xf32>
    %115 = math.log %114 : vector<8x1xf32>
    %116 = arith.addf %115, %109 : vector<8x1xf32>
    %117 = vector.broadcast %116 : vector<8x1xf32> to vector<8x128xf32>
    %118 = arith.subf %107, %117 : vector<8x128xf32>
    %119 = vector.extract_strided_slice %118 {offsets = [0, 0], sizes = [2, 128], strides = [1, 1]} : vector<8x128xf32> to vector<2x128xf32>
    %c0_64 = arith.constant 0 : index
    %c0_65 = arith.constant 0 : index
    %120 = vector.load %arg16[%c0_64, %c0_65] : memref<2x128xf32, #tpu.memory_space<vmem>>, vector<2x128xf32>
    tpu.vector_store %arg16[%c0_64, %c0_65], %119 {strides = array<i32>} : memref<2x128xf32, #tpu.memory_space<vmem>>, vector<2x128xf32>,
    return
  }
  func.func @transform_0(%arg0: i32) -> (i32, i32) {
    %c0_i32 = arith.constant 0 : i32
    %c0_i32_0 = arith.constant 0 : i32
    return %arg0, %c0_i32 : i32, i32
  }
  func.func @transform_1(%arg0: i32) -> (i32, i32, i32) {
    %c0_i32 = arith.constant 0 : i32
    %c0_i32_0 = arith.constant 0 : i32
    %c0_i32_1 = arith.constant 0 : i32
    %c0_i32_2 = arith.constant 0 : i32
    return %c0_i32, %c0_i32_0, %c0_i32_1 : i32, i32, i32
  }
  func.func @transform_2(%arg0: i32) -> (i32, i32) {
    %c0_i32 = arith.constant 0 : i32
    %c0_i32_0 = arith.constant 0 : i32
    %c0_i32_1 = arith.constant 0 : i32
    return %c0_i32, %c0_i32_0 : i32, i32
  }
  func.func @transform_3(%arg0: i32) -> (i32, i32) {
    %c0_i32 = arith.constant 0 : i32
    %c0_i32_0 = arith.constant 0 : i32
    %c0_i32_1 = arith.constant 0 : i32
    return %c0_i32, %c0_i32_0 : i32, i32
  }
  func.func @transform_4(%arg0: i32) -> (i32, i32, i32) {
    %c0_i32 = arith.constant 0 : i32
    %c0_i32_0 = arith.constant 0 : i32
    %c0_i32_1 = arith.constant 0 : i32
    %c0_i32_2 = arith.constant 0 : i32
    return %c0_i32, %c0_i32_0, %c0_i32_1 : i32, i32, i32
  }
  func.func @transform_5(%arg0: i32) -> (i32, i32) {
    %c0_i32 = arith.constant 0 : i32
    %c0_i32_0 = arith.constant 0 : i32
    %c0_i32_1 = arith.constant 0 : i32
    return %c0_i32, %c0_i32_0 : i32, i32
  }
  func.func @transform_6(%arg0: i32) -> (i32, i32) {
    %c0_i32 = arith.constant 0 : i32
    %c0_i32_0 = arith.constant 0 : i32
    %c0_i32_1 = arith.constant 0 : i32
    return %c0_i32, %c0_i32_0 : i32, i32
  }
  func.func @transform_7(%arg0: i32) -> (i32, i32, i32) {
    %c0_i32 = arith.constant 0 : i32
    %c0_i32_0 = arith.constant 0 : i32
    %c0_i32_1 = arith.constant 0 : i32
    %c0_i32_2 = arith.constant 0 : i32
    return %c0_i32, %c0_i32_0, %c0_i32_1 : i32, i32, i32
  }
  func.func @transform_8(%arg0: i32) -> (i32, i32) {
    %c0_i32 = arith.constant 0 : i32
    %c0_i32_0 = arith.constant 0 : i32
    %c0_i32_1 = arith.constant 0 : i32
    return %c0_i32, %c0_i32_0 : i32, i32
  }
  func.func @transform_9(%arg0: i32) -> (i32, i32) {
    %c0_i32 = arith.constant 0 : i32
    %c0_i32_0 = arith.constant 0 : i32
    %c0_i32_1 = arith.constant 0 : i32
    return %c0_i32, %c0_i32_0 : i32, i32
  }
  func.func @transform_10(%arg0: i32) -> (i32, i32) {
    %c0_i32 = arith.constant 0 : i32
    %c0_i32_0 = arith.constant 0 : i32
    %c0_i32_1 = arith.constant 0 : i32
    return %c0_i32, %c0_i32_0 : i32, i32
  }
  func.func @transform_11(%arg0: i32) -> (i32, i32) {
    %c0_i32 = arith.constant 0 : i32
    %c0_i32_0 = arith.constant 0 : i32
    %c0_i32_1 = arith.constant 0 : i32
    return %c0_i32, %c0_i32_0 : i32, i32
  }
  func.func @transform_12(%arg0: i32) -> (i32, i32) {
    %c0_i32 = arith.constant 0 : i32
    %c0_i32_0 = arith.constant 0 : i32
    %c0_i32_1 = arith.constant 0 : i32
    return %c0_i32, %c0_i32_0 : i32, i32
  }
  func.func @transform_13(%arg0: i32) -> (i32, i32) {
    %c0_i32 = arith.constant 0 : i32
    %c0_i32_0 = arith.constant 0 : i32
    %c0_i32_1 = arith.constant 0 : i32
    return %c0_i32, %c0_i32_0 : i32, i32
  }
  func.func @transform_14(%arg0: i32) -> (i32, i32) {
    %c0_i32 = arith.constant 0 : i32
    %c0_i32_0 = arith.constant 0 : i32
    %c0_i32_1 = arith.constant 0 : i32
    return %c0_i32, %c0_i32_0 : i32, i32
  }
  func.func @transform_15(%arg0: i32) -> (i32, i32) {
    %c0_i32 = arith.constant 0 : i32
    %c0_i32_0 = arith.constant 0 : i32
    return %arg0, %c0_i32 : i32, i32
  }
}

</mosaic_0001>

<bundles_post_ra>
// kernel: solution_model_forward.1
= control target key start
LH: loop header
LB: loop body
LE: loop exit
PB: predicated region body
PF: predicated region fallthrough
CT: control target
= control target key end

     0   :  { %20 = vsyncpa [#allocation3], 0  ;;  %s3212_s0 = inlined_call_operand.vmem [shape: f32[56,28], index: 0, kind: input, shape index: {}]   ;;  %s3213_s1 = inlined_call_operand.hbm [shape: bf16[3,28,256], index: 1, kind: input, shape index: {}]   ;;  %s3214_s2 = inlined_call_operand.vmem [shape: bf16[64,54], index: 2, kind: input, shape index: {}]   ;;  %s3215_s3 = inlined_call_operand.hbm [shape: f32[1,128], index: 3, kind: input, shape index: {}]   ;;  %s3216_s4 = inlined_call_operand.hbm [shape: bf16[3,128,256], index: 4, kind: input, shape index: {}]   ;;  %s3217_s5 = inlined_call_operand.hbm [shape: bf16[32,30], index: 5, kind: input, shape index: {}]   ;;  %s3218_s6 = inlined_call_operand.hbm [shape: f32[1,128], index: 6, kind: input, shape index: {}]   ;;  %s3219_s7 = inlined_call_operand.hbm [shape: bf16[2,128,256], index: 7, kind: input, shape index: {}]   ;;  %s3220_s8 = inlined_call_operand.vmem [shape: bf16[16,15], index: 8, kind: input, shape index: {}]   ;;  %s3221_s9 = inlined_call_operand.hbm [shape: f32[1,128], index: 9, kind: input, shape index: {}]   ;;  %s3222_s10 = inlined_call_operand.vmem [shape: bf16[16,8], index: 10, kind: input, shape index: {}]   ;;  %s3223_s11 = inlined_call_operand.hbm [shape: bf16[256,128], index: 11, kind: input, shape index: {}]   ;;  %s3224_s12 = inlined_call_operand.hbm [shape: f32[1,128], index: 12, kind: input, shape index: {}]   ;;  %s3225_s13 = inlined_call_operand.vmem [shape: bf16[128,128], index: 13, kind: input, shape index: {}]   ;;  %s3226_s14 = inlined_call_operand.hbm [shape: f32[1,128], index: 14, kind: input, shape index: {}]   ;;  %s3227_s15 = inlined_call_operand.hbm [shape: f32[2,128], index: 15, kind: output, shape index: {}]  }
   0x1   :  { %21 = vsyncpa [#allocation6], 0 }
   0x2   :  { %22 = vsyncpa [#allocation9], 0 }
   0x3   :  { %23 = vsyncpa [#allocation12], 0 }
   0x4   :  { %24 = vsyncpa [#allocation15], 0 }
   0x5   :  { %25 = vsyncpa [#allocation18], 0 }
   0x6   :  { %26 = vsyncpa [#allocation4], 0  ;;  %s2792_s18 = smov [#allocation5]   ;;  %s2793_s20 = smov [#allocation8]  }
   0x7   :  { %s49_s19 = sshll.u32 %s2792_s18, 4  ;;  %s70_s21 = sshll.u32 %s2793_s20, 4  ;;  %s50_s19 = int_to_ptr.vmem [resolvable:$true] %s49_s19  ;;  %s2891_s21 = int_to_ptr.vmem [resolvable:$true] %s70_s21 }
   0x8   :  { %s2536_s24 = scalar_lea.hbm %s3215_s3, 16 }
   0x9   :  { %p2537_p0 = scmp.ne.s32.totalorder %s3215_s3, %s2536_s24  ;;  %p2540_p1 = scmp.lt.u32.totalorder %s2536_s24, %s3215_s3 }
   0xb   :  { %p2542_p2 = pnand %p2540_p1, %p2537_p0 }
   0xd   :  { %2545 = shalt.err (!%p2542_p2)
}
   0xe   :  { %s2546_s29 = scalar_lea.vmem %s50_s19, 16  ;;  %s2550_s30 = scalar_lea.vmem %s50_s19, 32 }
   0xf   :  { %p2547_p3 = scmp.ne.s32.totalorder %s50_s19, %s2546_s29  ;;  %p2551_p4 = scmp.lt.s32.totalorder %s50_s19, %s50_s19 }
  0x10   :  { %p2552_p5 = scmp.lt.s32.totalorder %s2550_s30, %s2546_s29 }
  0x12   :  { %p2553_p6 = por %p2552_p5, %p2551_p4 }
  0x14   :  { %p2554_p7 = pnand %p2553_p6, %p2547_p3 }
  0x16   :  { %2557 = shalt.err (!%p2554_p7)
}
  0x17   :  { %52 = dma.hbm_to_vmem [thread:$0]  %s3215_s3, 16, %s50_s19, [#allocation6]  }
  0x18   :  { %s2558_s22 = scalar_lea.hbm %s3217_s5, 256 }
  0x19   :  { %p2559_p8 = scmp.ne.s32.totalorder %s3217_s5, %s2558_s22  ;;  %p2562_p9 = scmp.lt.u32.totalorder %s2558_s22, %s3217_s5 }
  0x1b   :  { %p2564_p10 = pnand %p2562_p9, %p2559_p8 }
  0x1d   :  { %2567 = shalt.err (!%p2564_p10)
}
  0x1e   :  { %s2568_s27 = scalar_lea.vmem %s2891_s21, 256  ;;  %p2573_p12 = scmp.lt.s32.totalorder %s2891_s21, %s2891_s21 }
  0x1f   :  { %p2569_p11 = scmp.ne.s32.totalorder %s2891_s21, %s2568_s27  ;;  %p2574_p13 = scmp.lt.s32.totalorder %s2568_s27, %s2568_s27 }
  0x21   :  { %p2575_p0 = por %p2574_p13, %p2573_p12 }
  0x23   :  { %p2576_p1 = pnand %p2575_p0, %p2569_p11 }
  0x25   :  { %2579 = shalt.err (!%p2576_p1)
}
  0x26   :  { %s2794_s3 = smov 64   ;;  %s2795_s19 = smov 4  }
  0x27   :  { %76 = dma.hbm_to_vmem [thread:$0]  %s3217_s5, 256, %s2891_s21, [#allocation9], %s2794_s3, %s2794_s3, %s2795_s19  }
  0x28   :  { %s2796_s30 = smov [#allocation11]   ;;  %s2797_s17 = smov [#allocation14]  }
  0x29   :  { %s92_s16 = sshll.u32 %s2796_s30, 4  ;;  %s118_s18 = sshll.u32 %s2797_s17, 4  ;;  %s93_s16 = int_to_ptr.vmem [resolvable:$true] %s92_s16  ;;  %s2925_s18 = int_to_ptr.vmem [resolvable:$true] %s118_s18 }
  0x2a   :  { %s2580_s23 = scalar_lea.hbm %s3219_s7, 4096 }
  0x2b   :  { %p2581_p2 = scmp.ne.s32.totalorder %s3219_s7, %s2580_s23  ;;  %p2584_p3 = scmp.lt.u32.totalorder %s2580_s23, %s3219_s7 }
  0x2d   :  { %p2586_p4 = pnand %p2584_p3, %p2581_p2 }
  0x2f   :  { %2589 = shalt.err (!%p2586_p4)
}
  0x30   :  { %s2590_s5 = scalar_lea.vmem %s93_s16, 4096  ;;  %p2595_p6 = scmp.lt.s32.totalorder %s93_s16, %s93_s16 }
  0x31   :  { %p2591_p5 = scmp.ne.s32.totalorder %s93_s16, %s2590_s5  ;;  %p2596_p7 = scmp.lt.s32.totalorder %s2590_s5, %s2590_s5 }
  0x33   :  { %p2597_p8 = por %p2596_p7, %p2595_p6 }
  0x35   :  { %p2598_p9 = pnand %p2597_p8, %p2591_p5 }
  0x37   :  { %2601 = shalt.err (!%p2598_p9)
}
  0x38   :  { %s2798_s21 = smov 128   ;;  %s2799_s28 = smov 8  }
  0x39   :  { %98 = dma.hbm_to_vmem [thread:$0]  %s3219_s7, 4096, %s93_s16, [#allocation12], %s2798_s21, %s2798_s21, %s2799_s28  }
  0x3a   :  { %s2602_s22 = scalar_lea.hbm %s3223_s11, 2048 }
  0x3b   :  { %p2603_p10 = scmp.ne.s32.totalorder %s3223_s11, %s2602_s22  ;;  %p2606_p11 = scmp.lt.u32.totalorder %s2602_s22, %s3223_s11 }
  0x3d   :  { %p2608_p12 = pnand %p2606_p11, %p2603_p10 }
  0x3f   :  { %2611 = shalt.err (!%p2608_p12)
}
  0x40   :  { %s2612_s27 = scalar_lea.vmem %s2925_s18, 2048  ;;  %p2617_p0 = scmp.lt.s32.totalorder %s2925_s18, %s2925_s18 }
  0x41   :  { %p2613_p13 = scmp.ne.s32.totalorder %s2925_s18, %s2612_s27  ;;  %p2618_p1 = scmp.lt.s32.totalorder %s2612_s27, %s2612_s27 }
  0x43   :  { %p2619_p2 = por %p2618_p1, %p2617_p0 }
  0x45   :  { %p2620_p3 = pnand %p2619_p2, %p2613_p13 }
  0x47   :  { %2623 = shalt.err (!%p2620_p3)
}
  0x48   :  { %124 = dma.hbm_to_vmem [thread:$0]  %s3223_s11, 2048, %s2925_s18, [#allocation15], %s2794_s3, %s2794_s3, %s2795_s19  }
  0x49   :  { %s2800_s5 = smov [#allocation2]   ;;  %s2801_s30 = smov [#allocation7]  }
  0x4a   :  { %s34_s29 = sshll.u32 %s2800_s5, 4  ;;  %s58_s17 = sshll.u32 %s2801_s30, 4  ;;  %s35_s29 = int_to_ptr.vmem [resolvable:$true] %s34_s29  ;;  %s2962_s17 = int_to_ptr.vmem [resolvable:$true] %s58_s17 }
  0x4b   :  { %s2624_s23 = scalar_lea.hbm %s3213_s1, 1536 }
  0x4c   :  { %p2625_p4 = scmp.ne.s32.totalorder %s3213_s1, %s2624_s23  ;;  %p2628_p5 = scmp.lt.u32.totalorder %s2624_s23, %s3213_s1 }
  0x4e   :  { %p2630_p6 = pnand %p2628_p5, %p2625_p4 }
  0x50   :  { %2633 = shalt.err (!%p2630_p6)
}
  0x51   :  { %s2634_s11 = scalar_lea.vmem %s35_s29, 1536  ;;  %p2639_p8 = scmp.lt.s32.totalorder %s35_s29, %s35_s29 }
  0x52   :  { %p2635_p7 = scmp.ne.s32.totalorder %s35_s29, %s2634_s11  ;;  %p2640_p9 = scmp.lt.s32.totalorder %s2634_s11, %s2634_s11 }
  0x54   :  { %p2641_p10 = por %p2640_p9, %p2639_p8 }
  0x56   :  { %p2642_p11 = pnand %p2641_p10, %p2635_p7 }
  0x58   :  { %2645 = shalt.err (!%p2642_p11)
}
  0x59   :  { %40 = dma.hbm_to_vmem [thread:$0]  %s3213_s1, 1536, %s35_s29, [#allocation3], %s2798_s21, %s2798_s21, %s2799_s28  }
  0x5a   :  { %s2646_s16 = scalar_lea.hbm %s3216_s4, 6144 }
  0x5b   :  { %p2647_p12 = scmp.ne.s32.totalorder %s3216_s4, %s2646_s16  ;;  %p2650_p13 = scmp.lt.u32.totalorder %s2646_s16, %s3216_s4 }
  0x5d   :  { %p2652_p0 = pnand %p2650_p13, %p2647_p12 }
  0x5f   :  { %2655 = shalt.err (!%p2652_p0)
}
  0x60   :  { %s2656_s23 = scalar_lea.vmem %s2962_s17, 6144  ;;  %p2661_p2 = scmp.lt.s32.totalorder %s2962_s17, %s2962_s17 }
  0x61   :  { %p2657_p1 = scmp.ne.s32.totalorder %s2962_s17, %s2656_s23  ;;  %p2662_p3 = scmp.lt.s32.totalorder %s2656_s23, %s2656_s23 }
  0x63   :  { %p2663_p4 = por %p2662_p3, %p2661_p2 }
  0x65   :  { %p2664_p5 = pnand %p2663_p4, %p2657_p1 }
  0x67   :  { %2667 = shalt.err (!%p2664_p5)
}
  0x68   :  { %64 = dma.hbm_to_vmem [thread:$0]  %s3216_s4, 6144, %s2962_s17, [#allocation6], %s2798_s21, %s2798_s21, %s2799_s28  }
  0x69   :  { %s2802_s24 = smov [#allocation10]   ;;  %s2803_s26 = smov [#allocation13]  }
  0x6a   :  { %s83_s25 = sshll.u32 %s2802_s24, 4  ;;  %s107_s27 = sshll.u32 %s2803_s26, 4  ;;  %s84_s25 = int_to_ptr.vmem [resolvable:$true] %s83_s25  ;;  %s108_s27 = int_to_ptr.vmem [resolvable:$true] %s107_s27 }
  0x6b   :  { %s2668_s19 = scalar_lea.hbm %s3218_s6, 16 }
  0x6c   :  { %p2669_p6 = scmp.ne.s32.totalorder %s3218_s6, %s2668_s19  ;;  %p2672_p7 = scmp.lt.u32.totalorder %s2668_s19, %s3218_s6 }
  0x6e   :  { %p2674_p8 = pnand %p2672_p7, %p2669_p6 }
  0x70   :  { %2677 = shalt.err (!%p2674_p8)
}
  0x71   :  { %s2678_s4 = scalar_lea.vmem %s84_s25, 16  ;;  %s2682_s21 = scalar_lea.vmem %s84_s25, 32 }
  0x72   :  { %p2679_p9 = scmp.ne.s32.totalorder %s84_s25, %s2678_s4  ;;  %p2683_p10 = scmp.lt.s32.totalorder %s84_s25, %s84_s25 }
  0x73   :  { %p2684_p11 = scmp.lt.s32.totalorder %s2682_s21, %s2678_s4 }
  0x75   :  { %p2685_p12 = por %p2684_p11, %p2683_p10 }
  0x77   :  { %p2686_p13 = pnand %p2685_p12, %p2679_p9 }
  0x79   :  { %2689 = shalt.err (!%p2686_p13)
}
  0x7a   :  { %86 = dma.hbm_to_vmem [thread:$0]  %s3218_s6, 16, %s84_s25, [#allocation9]  }
  0x7b   :  { %s2690_s22 = scalar_lea.hbm %s3221_s9, 16 }
  0x7c   :  { %p2691_p0 = scmp.ne.s32.totalorder %s3221_s9, %s2690_s22  ;;  %p2694_p1 = scmp.lt.u32.totalorder %s2690_s22, %s3221_s9 }
  0x7e   :  { %p2696_p2 = pnand %p2694_p1, %p2691_p0 }
  0x80   :  { %2699 = shalt.err (!%p2696_p2)
}
  0x81   :  { %s2700_s26 = scalar_lea.vmem %s108_s27, 16  ;;  %s2704_s11 = scalar_lea.vmem %s108_s27, 32 }
  0x82   :  { %p2701_p3 = scmp.ne.s32.totalorder %s108_s27, %s2700_s26  ;;  %p2705_p4 = scmp.lt.s32.totalorder %s108_s27, %s108_s27 }
  0x83   :  { %p2706_p5 = scmp.lt.s32.totalorder %s2704_s11, %s2700_s26 }
  0x85   :  { %p2707_p6 = por %p2706_p5, %p2705_p4 }
  0x87   :  { %p2708_p7 = pnand %p2707_p6, %p2701_p3 }
  0x89   :  { %2711 = shalt.err (!%p2708_p7)
}
  0x8a   :  { %110 = dma.hbm_to_vmem [thread:$0]  %s3221_s9, 16, %s108_s27, [#allocation12]  }
  0x8b   :  { %s2804_s3 = smov [#allocation16]   ;;  %s2805_s18 = smov [#allocation17]  }
  0x8c   :  { %s131_s19 = sshll.u32 %s2804_s3, 4  ;;  %s143_s7 = sshll.u32 %s2805_s18, 4  ;;  %s132_s19 = int_to_ptr.vmem [resolvable:$true] %s131_s19  ;;  %s144_s7 = int_to_ptr.vmem [resolvable:$true] %s143_s7 }
  0x8d   :  { %s2712_s4 = scalar_lea.hbm %s3224_s12, 16 }
  0x8e   :  { %p2713_p8 = scmp.ne.s32.totalorder %s3224_s12, %s2712_s4  ;;  %p2716_p9 = scmp.lt.u32.totalorder %s2712_s4, %s3224_s12 }
  0x90   :  { %p2718_p10 = pnand %p2716_p9, %p2713_p8 }
  0x92   :  { %2721 = shalt.err (!%p2718_p10)
}
  0x93   :  { %s2722_s9 = scalar_lea.vmem %s132_s19, 16  ;;  %s2726_s27 = scalar_lea.vmem %s132_s19, 32 }
  0x94   :  { %p2723_p11 = scmp.ne.s32.totalorder %s132_s19, %s2722_s9  ;;  %p2727_p12 = scmp.lt.s32.totalorder %s132_s19, %s132_s19 }
  0x95   :  { %p2728_p13 = scmp.lt.s32.totalorder %s2726_s27, %s2722_s9 }
  0x97   :  { %p2729_p0 = por %p2728_p13, %p2727_p12 }
  0x99   :  { %p2730_p1 = pnand %p2729_p0, %p2723_p11 }
  0x9b   :  { %2733 = shalt.err (!%p2730_p1)
}
  0x9c   :  { %134 = dma.hbm_to_vmem [thread:$0]  %s3224_s12, 16, %s132_s19, [#allocation15]  }
  0x9d   :  { %s2734_s29 = scalar_lea.hbm %s3226_s14, 16 }
  0x9e   :  { %p2735_p2 = scmp.ne.s32.totalorder %s3226_s14, %s2734_s29  ;;  %p2738_p3 = scmp.lt.u32.totalorder %s2734_s29, %s3226_s14 }
  0xa0   :  { %p2740_p4 = pnand %p2738_p3, %p2735_p2 }
  0xa2   :  { %2743 = shalt.err (!%p2740_p4)
}
  0xa3   :  { %s2744_s25 = scalar_lea.vmem %s144_s7, 16  ;;  %s2748_s3 = scalar_lea.vmem %s144_s7, 32 }
  0xa4   :  { %p2745_p5 = scmp.ne.s32.totalorder %s144_s7, %s2744_s25  ;;  %p2749_p6 = scmp.lt.s32.totalorder %s144_s7, %s144_s7 }
  0xa5   :  { %p2750_p7 = scmp.lt.s32.totalorder %s2748_s3, %s2744_s25 }
  0xa7   :  { %p2751_p8 = por %p2750_p7, %p2749_p6 }
  0xa9   :  { %p2752_p9 = pnand %p2751_p8, %p2745_p5 }
  0xab   :  { %2755 = shalt.err (!%p2752_p9)
}
  0xac   :  { %146 = dma.hbm_to_vmem [thread:$0]  %s3226_s14, 16, %s144_s7, [#allocation18]  }
  0xad   :  { %2778 = dma.done.wait [#allocation3], 1536  }
  0xae   :  { %2779 = vsyncadd [#allocation3], 4294965760 }
  0xaf   :  { %2780 = dma.done.wait [#allocation6], 6160  }
  0xb0   :  { %2781 = vsyncadd [#allocation6], 4294961136 }
  0xb1   :  { %2782 = dma.done.wait [#allocation9], 272  }
  0xb2   :  { %2783 = vsyncadd [#allocation9], 4294967024 }
  0xb3   :  { %2784 = dma.done.wait [#allocation12], 4112  }
  0xb4   :  { %2785 = vsyncadd [#allocation12], 4294963184 }
  0xb5   :  { %2786 = dma.done.wait [#allocation15], 2064  }
  0xb6   :  { %2787 = vsyncadd [#allocation15], 4294965232 }
  0xb7   :  { %2788 = dma.done.wait [#allocation18], 16  }
  0xb8   :  { %2789 = vsyncadd [#allocation18], 4294967280  ;;  %v2806_v0 = vmov 0   ;;  %v2362_v1 = vld [vmem:[#allocation2 + $0x24] ss:$8 sps:$4 sm:$0xff]   ;;  %vm261_vm0 = vcmask 1045504  }
  0xb9   :  { %300 = vmatprep.mubr.bf16.mxu0 %v2806_v0  ;;  %v2364_v2 = vld [vmem:[#allocation2 + $0x20] ss:$8 sps:$4 sm:$0xff]   ;;  %268 = vmatprep.subr.bf16.mxu0 %v2362_v1  ;;  %v2365_v3 = vld [vmem:[#allocation2 + $0x34] ss:$8 sps:$4 sm:$0x3f]   ;;  %vm248_vm2 = vcmask 228352  }
  0xba   :  { %v2367_v4 = vld [vmem:[#allocation2 + $0x30] ss:$8 sps:$4 sm:$0x3f]   ;;  %269 = vmatpush1.bf16.msra.mxu0 %v2364_v2  ;;  %v178_v5 = vld [vmem:[%s3212_s0] sm:$0xff]  ;;  %v179_v6 = vld [vmem:[%s3212_s0 + $0x8] sm:$0xff]  ;;  %vm451_vm3 = vcmask 1046528  }
  0xbb   :  { %v180_v7 = vld [vmem:[%s3212_s0 + $0x10] sm:$0xff]  ;;  %2038 = vmatprep.subr.msk.bf16.mxu0 %vm261_vm0, %v2365_v3  ;;  %v263_v8 = vsel %vm261_vm0, %v2367_v4, 0  ;;  %v181_v9 = vld [vmem:[%s3212_s0 + $0x18] sm:$0xff]  ;;  %v185_v10 = vpack.c.bf16 %v179_v6, %v178_v5  ;;  %vm198_vm1 = vsmask.f32 7424  ;;  %v182_v13 = vld [vmem:[%s3212_s0 + $0x20] sm:$0xff] }
  0xbc   :  { %v3062_v11 = vpack.c.bf16 %v181_v9, %v180_v7  ;;  %v2370_v12 = vld [vmem:[#allocation2 + $0x4] ss:$8 sps:$4 sm:$0xff]   ;;  %v184_v17 = vld [vmem:[%s3212_s0 + $0x30] sm:$0xff]  ;;  %v2368_v21 = vld [vmem:[#allocation2] ss:$8 sps:$4 sm:$0xff]   ;;  %vm619_vm4 = vcmask 441344  }
  0xbd   :  { %v200_v14 = vshrl.u32 %v185_v10, 16  ;;  %v202_v15 = vshll.u32 %v185_v10, 16  ;;  %v183_v16 = vld [vmem:[%s3212_s0 + $0x28] sm:$0xff]  ;;  %v452_v22 = vrot.slane %v185_v10, 1  ;;  %v188_v28 = vpack.c.bf16 %v184_v17, %v184_v17  ;;  %v2380_v53 = vld [vmem:[%s3214_s2] sm:$0xff]  }
  0xbe   :  { %271 = vmatpush1.bf16.msra.mxu0 %v263_v8  ;;  %v207_v18 = vshll.u32 %v3062_v11, 16  ;;  %v187_v19 = vpack.c.bf16 %v183_v16, %v182_v13  ;;  %v2371_v25 = vld [vmem:[#allocation2 + $0x14] ss:$8 sps:$4 sm:$0x3f]   ;;  %v211_v27 = vshrl.u32 %v3062_v11, 16  ;;  %v453_v30 = vrot.slane %v3062_v11, 1  ;;  %2241 = vmatprep.mubr.msk.bf16.mxu1 %vm619_vm4, %v2380_v53 }
  0xbf   :  { %v204_v20 = vrot.slane %v202_v15, 1  ;;  %371 = vmatprep.subr.bf16.mxu0 %v2370_v12  ;;  %v2373_v29 = vld [vmem:[#allocation2 + $0x10] ss:$8 sps:$4 sm:$0x3f]   ;;  %v457_v34 = vrot.slane %v188_v28, 1  ;;  %v223_v43 = vshll.u32 %v188_v28, 16 }
  0xc0   :  { %v209_v23 = vrot.slane %v207_v18, 1  ;;  %v215_v24 = vshll.u32 %v187_v19, 16  ;;  %v455_v31 = vrot.slane %v187_v19, 1  ;;  %v454_v33 = vsel %vm451_vm3, %v452_v22, %v453_v30  ;;  %v2376_v36 = vld [vmem:[#allocation2 + $0x44] ss:$8 sps:$4 sm:$0xff]  }
  0xc1   :  { %v205_v26 = vor.u32 %v204_v20, %v200_v14  ;;  %v366_v40 = vsel %vm261_vm0, %v2373_v29, 0  ;;  %v219_v42 = vshrl.u32 %v187_v19, 16  ;;  %v225_v45 = vrot.slane %v223_v43, 1  ;;  %v2379_v49 = vld [vmem:[#allocation2 + $0x50] ss:$8 sps:$4 sm:$0x3f]  }
  0xc2   :  { %v217_v35 = vrot.slane %v215_v24, 1  ;;  %v456_v37 = vsel %vm451_vm3, %v453_v30, %v455_v31  ;;  %v213_v38 = vor.u32 %v211_v27, %v209_v23  ;;  %v458_v39 = vsel %vm451_vm3, %v455_v31, %v457_v34  ;;  %v2374_v50 = vld [vmem:[#allocation2 + $0x40] ss:$8 sps:$4 sm:$0xff]   ;;  %v2377_v51 = vld [vmem:[#allocation2 + $0x54] ss:$8 sps:$4 sm:$0x3f]  }
  0xc3   :  { %v210_v32 = vsel %vm198_vm1, %v205_v26, %v209_v23  ;;  %v227_v47 = vshrl.u32 %v188_v28, 16  ;;  %v490_v52 = vsel %vm261_vm0, %v2379_v49, 0  ;;  %vm632_vm5 = vcmask 1042432   ;;  %v2386_v18 = vld [vmem:[#allocation7 + $0x84] ss:$8 sps:$4 sm:$0xff]  }
  0xc4   :  { %2039 = vmatmul.mubr.msk.bf16.vlgmr.msra.gmra.mrb[0].mxu0 %vm248_vm2, %v210_v32  ;;  %v218_v41 = vsel %vm198_vm1, %v213_v38, %v217_v35  ;;  %v221_v44 = vor.u32 %v219_v42, %v217_v35  ;;  %v2381_v20 = vld [vmem:[%s3214_s2 + $0x8] sm:$0xff]   ;;  %v2389_v23 = vld [vmem:[#allocation7 + $0x94] ss:$8 sps:$4 sm:$0xff]   ;;  %v2387_v24 = vld [vmem:[#allocation7 + $0x90] ss:$8 sps:$4 sm:$0xff]   ;;  %vm1223_vm6 = vcmask 244736  }
  0xc5   :  { %372 = vmatpush1.bf16.msra.mxu0 %v2368_v21  ;;  %310 = vmatprep.mubr.bf16.mxu0 %v2806_v0  ;;  %v229_v48 = vor.u32 %v227_v47, %v225_v45  ;;  %v2382_v21 = vld [vmem:[%s3214_s2 + $0x10] sm:$0xff]   ;;  %v2384_v22 = vld [vmem:[#allocation7 + $0x80] ss:$8 sps:$4 sm:$0xff]   ;;  %vm2808_vm7 = vmmov 0   ;;  %vm1598_vm8 = vcmask 1047552   ;;  %vm1594_vm9 = vcmask 121856  }
  0xc6   :  { %2047 = vmatprep.subr.msk.bf16.mxu0 %vm261_vm0, %v2371_v25  ;;  %v226_v46 = vsel %vm198_vm1, %v221_v44, %v225_v45  ;;  %v2383_v25 = vld [vmem:[%s3214_s2 + $0x18] sm:$0xff]   ;;  %v2392_v26 = vld [vmem:[#allocation7 + $0xa4] ss:$8 sps:$4 sm:$0xff]   ;;  %v2390_v27 = vld [vmem:[#allocation7 + $0xa0] ss:$8 sps:$4 sm:$0xff]   ;;  %vm1667_vm10 = vcmask 1043456  }
  0xc7   :  { %v2395_v29 = vld [vmem:[#allocation7 + $0xb4] ss:$8 sps:$4 sm:$0xff]   ;;  %v2398_v30 = vld [vmem:[#allocation7 + $0xc4] ss:$8 sps:$4 sm:$0xff]   ;;  %v2396_v31 = vld [vmem:[#allocation7 + $0xc0] ss:$8 sps:$4 sm:$0xff]  }
  0xc8   :  { %v2401_v32 = vld [vmem:[#allocation7 + $0xd4] ss:$8 sps:$4 sm:$0xff]   ;;  %v2402_v35 = vld [vmem:[#allocation7 + $0xe0] ss:$8 sps:$4 sm:$0xff]   ;;  %v2410_v38 = vld [vmem:[#allocation7 + $0x4] ss:$8 sps:$4 sm:$0xff]  }
  0xc9   :  { %374 = vmatpush1.bf16.msra.mxu0 %v366_v40  ;;  %v2069_v44 = vld [vmem:[#allocation5] ss:$0 sm:$0xff]  ;;  %vm1663_vm11 = vcmask 64512  }
  0xca   :  { %495 = vmatprep.subr.bf16.mxu0 %v2376_v36  ;;  %v2407_v36 = vld [vmem:[#allocation7 + $0xf4] ss:$8 sps:$4 sm:$0xff]  }
  0xcc   :  { %2040 = vmatmul.mubr.msk.bf16.gmra.mrb[4].mxu0 %vm248_vm2, %v218_v41 }
  0xcd   :  { %320 = vmatprep.mubr.bf16.mxu0 %v2806_v0 }
  0xd4   :  { %2041 = vmatmul.mubr.msk.bf16.gmra.mrb[8].mxu0 %vm248_vm2, %v226_v46 }
  0xd5   :  { %330 = vmatprep.mubr.bf16.mxu0 %v2806_v0 }
  0xdc   :  { %2042 = vmatmul.mubr.msk.bf16.gmra.mrb[12].mxu0 %vm248_vm2, %v229_v48 }
  0xdd   :  { %403 = vmatprep.mubr.bf16.mxu0 %v2806_v0 }
  0xe4   :  { %2048 = vmatmul.mubr.msk.bf16.vlgmr.msra.gmra.mrb[0].mxu0 %vm248_vm2, %v185_v10 }
  0xe5   :  { %496 = vmatpush1.bf16.msra.mxu0 %v2374_v50  ;;  %413 = vmatprep.mubr.bf16.mxu0 %v2806_v0 }
  0xe6   :  { %2056 = vmatprep.subr.msk.bf16.mxu0 %vm261_vm0, %v2377_v51 }
  0xe9   :  { %498 = vmatpush1.bf16.msra.mxu0 %v490_v52 }
  0xec   :  { %2049 = vmatmul.mubr.msk.bf16.gmra.mrb[4].mxu0 %vm248_vm2, %v3062_v11 }
  0xed   :  { %423 = vmatprep.mubr.bf16.mxu0 %v2806_v0 }
  0xf4   :  { %2050 = vmatmul.mubr.msk.bf16.gmra.mrb[8].mxu0 %vm248_vm2, %v187_v19 }
  0xf5   :  { %433 = vmatprep.mubr.bf16.mxu0 %v2806_v0 }
  0xfc   :  { %2051 = vmatmul.mubr.msk.bf16.gmra.mrb[12].mxu0 %vm248_vm2, %v188_v28  ;;  %v2393_v28 = vld [vmem:[#allocation7 + $0xb0] ss:$8 sps:$4 sm:$0xff]  }
  0xfd   :  { %527 = vmatprep.mubr.bf16.mxu0 %v2806_v0 }
 0x104   :  { %2057 = vmatmul.mubr.msk.bf16.vlgmr.msra.gmra.mrb[0].mxu0 %vm248_vm2, %v454_v33  ;;  %v2399_v33 = vld [vmem:[#allocation7 + $0xd0] ss:$8 sps:$4 sm:$0xff]  }
 0x105   :  { %537 = vmatprep.mubr.bf16.mxu0 %v2806_v0 }
 0x10c   :  { %2058 = vmatmul.mubr.msk.bf16.gmra.mrb[4].mxu0 %vm248_vm2, %v456_v37  ;;  %v2405_v37 = vld [vmem:[#allocation7 + $0xf0] ss:$8 sps:$4 sm:$0xff]  }
 0x10d   :  { %547 = vmatprep.mubr.bf16.mxu0 %v2806_v0 }
 0x114   :  { %2059 = vmatmul.mubr.msk.bf16.gmra.mrb[8].mxu0 %vm248_vm2, %v458_v39 }
 0x115   :  { %557 = vmatprep.mubr.bf16.mxu0 %v2806_v0 }
 0x11c   :  { %2060 = vmatmul.mubr.msk.bf16.gmra.mrb[12].mxu0 %vm248_vm2, %v457_v34  ;;  %v2404_v34 = vld [vmem:[#allocation7 + $0xe4] ss:$8 sps:$4 sm:$0xff]  }
 0x11d   :  { %1450 = vmatprep.mubr.bf16.mxu0 %v2806_v0 }
 0x1d7   :  { %v529_v54 = vpop.f32.mrb[0].mxu0 }
 0x1d8   :  { %v531_v55 = vpop.f32.mrb[1].mxu0 }
 0x1d9   :  { %v580_v56 = vmax.f32 %v529_v54, %v531_v55  ;;  %v533_v57 = vpop.f32.mrb[2].mxu0 }
 0x1da   :  { %v535_v58 = vpop.f32.mrb[3].mxu0 }
 0x1db   :  { %v581_v59 = vmax.f32 %v533_v57, %v535_v58 }
 0x1dd   :  { %v595_v60 = vpack.c.bf16 %v581_v59, %v580_v56 }
 0x1df   :  { %v539_v61 = vpop.f32.mrb[4].mxu0  ;;  %2233 = vmatprep.subr.bf16.mxu1 %v595_v60 }
 0x1e0   :  { %v541_v62 = vpop.f32.mrb[5].mxu0  ;;  %2234 = vmatpush3.bf16.msra.mxu1 %v595_v60 }
 0x1e1   :  { %v582_v63 = vmax.f32 %v539_v61, %v541_v62  ;;  %v543_v1 = vpop.f32.mrb[6].mxu0 }
 0x1e2   :  { %v545_v2 = vpop.f32.mrb[7].mxu0 }
 0x1e3   :  { %v583_v3 = vmax.f32 %v543_v1, %v545_v2 }
 0x1e5   :  { %v596_v4 = vpack.c.bf16 %v583_v3, %v582_v63 }
 0x1e7   :  { %v549_v5 = vpop.f32.mrb[8].mxu0  ;;  %2235 = vmatprep.subr.bf16.mxu1 %v596_v4 }
 0x1e8   :  { %v551_v6 = vpop.f32.mrb[9].mxu0  ;;  %2236 = vmatpush3.bf16.msra.mxu1 %v596_v4 }
 0x1e9   :  { %v584_v7 = vmax.f32 %v549_v5, %v551_v6  ;;  %v553_v8 = vpop.f32.mrb[10].mxu0  ;;  %v2408_v6 = vld [vmem:[#allocation7] ss:$8 sps:$4 sm:$0xff]  }
 0x1ea   :  { %v555_v9 = vpop.f32.mrb[11].mxu0 }
 0x1eb   :  { %v585_v10 = vmax.f32 %v553_v8, %v555_v9  ;;  %v2413_v9 = vld [vmem:[#allocation7 + $0x14] ss:$8 sps:$4 sm:$0xff]  }
 0x1ed   :  { %v597_v11 = vpack.c.bf16 %v585_v10, %v584_v7 }
 0x1ef   :  { %v559_v12 = vpop.f32.mrb[12].mxu0  ;;  %2237 = vmatprep.subr.bf16.mxu1 %v597_v11 }
 0x1f0   :  { %v561_v13 = vpop.f32.mrb[13].mxu0  ;;  %2238 = vmatpush3.bf16.msra.mxu1 %v597_v11  ;;  %v2411_v11 = vld [vmem:[#allocation7 + $0x10] ss:$8 sps:$4 sm:$0xff]  }
 0x1f1   :  { %v586_v14 = vmax.f32 %v559_v12, %v561_v13  ;;  %v563_v15 = vpop.f32.mrb[14].mxu0  ;;  %v2416_v12 = vld [vmem:[#allocation7 + $0x24] ss:$8 sps:$4 sm:$0xff]  }
 0x1f2   :  { %v564_v16 = vpop.f32.mrb[15].mxu0 }
 0x1f3   :  { %v598_v17 = vpack.c.bf16 %v586_v14, %v586_v14  ;;  %v2414_v14 = vld [vmem:[#allocation7 + $0x20] ss:$8 sps:$4 sm:$0xff]   ;;  %v2419_v16 = vld [vmem:[#allocation7 + $0x34] ss:$8 sps:$4 sm:$0xff]  }
 0x1f5   :  { %2341 = vmatprep.subr.msk.bf16.mxu1 %vm632_vm5, %v598_v17  ;;  %v634_v19 = vsel %vm632_vm5, %v598_v17, 0  ;;  %v2417_v17 = vld [vmem:[#allocation7 + $0x30] ss:$8 sps:$4 sm:$0xff]  }
 0x1f6   :  { %2240 = vmatpush3.bf16.msra.mxu1 %v634_v19  ;;  %v2420_v19 = vld [vmem:[#allocation7 + $0x40] ss:$8 sps:$4 sm:$0xff]  }
 0x1f7   :  { %852 = vmatprep.subr.bf16.mxu1 %v2386_v18  ;;  %v2422_v18 = vld [vmem:[#allocation7 + $0x44] ss:$8 sps:$4 sm:$0xff]  }
 0x1f9   :  { %2242 = vmatmul.mubr.msk.bf16.vlgmr.msra.gmra.mrb[0].mxu1 %vm619_vm4, %v2381_v20  ;;  %v2425_v20 = vld [vmem:[#allocation7 + $0x54] ss:$8 sps:$4 sm:$0xff]  }
 0x1fa   :  { %2245 = vmatprep.mubr.msk.bf16.mxu1 %vm619_vm4, %v2382_v21  ;;  %853 = vmatpush1.bf16.msra.mxu1 %v2384_v22  ;;  %v2423_v21 = vld [vmem:[#allocation7 + $0x50] ss:$8 sps:$4 sm:$0xff]   ;;  %v2428_v22 = vld [vmem:[#allocation7 + $0x64] ss:$8 sps:$4 sm:$0xff]  }
 0x1fb   :  { %854 = vmatprep.subr.bf16.mxu1 %v2389_v23  ;;  %v2426_v23 = vld [vmem:[#allocation7 + $0x60] ss:$8 sps:$4 sm:$0xff]  }
 0x1fe   :  { %855 = vmatpush1.bf16.msra.mxu1 %v2387_v24  ;;  %v2431_v24 = vld [vmem:[#allocation7 + $0x74] ss:$8 sps:$4 sm:$0xff]  }
 0x1ff   :  { %856 = vmatprep.subr.bf16.mxu1 %v2392_v26  ;;  %v2434_v26 = vld [vmem:[#allocation7 + $0x104] ss:$8 sps:$4 sm:$0xff]  }
 0x201   :  { %2246 = vmatmul.mubr.msk.bf16.gmra.mrb[4].mxu1 %vm619_vm4, %v2383_v25  ;;  %v2429_v25 = vld [vmem:[#allocation7 + $0x70] ss:$8 sps:$4 sm:$0xff]  }
 0x202   :  { %884 = vmatprep.mubr.bf16.mxu1 %v2806_v0  ;;  %857 = vmatpush1.bf16.msra.mxu1 %v2390_v27  ;;  %v2432_v27 = vld [vmem:[#allocation7 + $0x100] ss:$8 sps:$4 sm:$0xff]  }
 0x203   :  { %858 = vmatprep.subr.bf16.mxu1 %v2395_v29  ;;  %v2435_v29 = vld [vmem:[#allocation7 + $0x110] ss:$8 sps:$4 sm:$0xff]  }
 0x206   :  { %859 = vmatpush1.bf16.msra.mxu1 %v2393_v28  ;;  %v2437_v28 = vld [vmem:[#allocation7 + $0x114] ss:$8 sps:$4 sm:$0xff]  }
 0x207   :  { %860 = vmatprep.subr.bf16.mxu1 %v2398_v30  ;;  %v2440_v30 = vld [vmem:[#allocation7 + $0x124] ss:$8 sps:$4 sm:$0xff]  }
 0x20a   :  { %861 = vmatpush1.bf16.msra.mxu1 %v2396_v31  ;;  %v2438_v31 = vld [vmem:[#allocation7 + $0x120] ss:$8 sps:$4 sm:$0xff]  }
 0x20b   :  { %862 = vmatprep.subr.bf16.mxu1 %v2401_v32  ;;  %v2443_v32 = vld [vmem:[#allocation7 + $0x134] ss:$8 sps:$4 sm:$0xff]  }
 0x20e   :  { %863 = vmatpush1.bf16.msra.mxu1 %v2399_v33  ;;  %v2441_v33 = vld [vmem:[#allocation7 + $0x130] ss:$8 sps:$4 sm:$0xff]  }
 0x20f   :  { %864 = vmatprep.subr.bf16.mxu1 %v2404_v34  ;;  %v2446_v34 = vld [vmem:[#allocation7 + $0x144] ss:$8 sps:$4 sm:$0xff]  }
 0x212   :  { %865 = vmatpush1.bf16.msra.mxu1 %v2402_v35  ;;  %v2444_v35 = vld [vmem:[#allocation7 + $0x140] ss:$8 sps:$4 sm:$0xff]  }
 0x213   :  { %866 = vmatprep.subr.bf16.mxu1 %v2407_v36  ;;  %v2449_v36 = vld [vmem:[#allocation7 + $0x154] ss:$8 sps:$4 sm:$0xff]  }
 0x216   :  { %867 = vmatpush1.bf16.msra.mxu1 %v2405_v37  ;;  %v2447_v37 = vld [vmem:[#allocation7 + $0x150] ss:$8 sps:$4 sm:$0xff]  }
 0x217   :  { %985 = vmatprep.subr.bf16.mxu1 %v2410_v38  ;;  %v2452_v38 = vld [vmem:[#allocation7 + $0x164] ss:$8 sps:$4 sm:$0xff]  }
 0x2cc   :  { %v2243_v39 = vpop.f32.mrb[0].mxu1 }
 0x2cd   :  { %v670_v40 = vpop.f32.mrb[1].mxu1 }
 0x2ce   :  { %v2244_v41 = vpop.f32.mrb[2].mxu1 }
 0x2cf   :  { %v673_v42 = vpop.f32.mrb[3].mxu1 }
 0x2d4   :  { %v2247_v43 = vpop.f32.mrb[4].mxu1 }
 0x2d5   :  { %v703_v45 = vmax.f32 %v2243_v39, %v2247_v43  ;;  %v686_v46 = vpop.f32.mrb[5].mxu1  ;;  %v2450_v39 = vld [vmem:[#allocation7 + $0x160] ss:$8 sps:$4 sm:$0xff]   ;;  %v2458_v43 = vld [vmem:[#allocation11 + $0x80] ss:$8 sps:$4 sm:$0xff]  }
 0x2d6   :  { %v701_v47 = vmax.f32 %v670_v40, %v686_v46  ;;  %v2248_v48 = vpop.f32.mrb[6].mxu1  ;;  %v2455_v40 = vld [vmem:[#allocation7 + $0x174] ss:$8 sps:$4 sm:$0xff]   ;;  %v2461_v46 = vld [vmem:[#allocation11 + $0x90] ss:$8 sps:$4 sm:$0xff]  }
 0x2d7   :  { %v714_v49 = vadd.f32 %v2069_v44, %v703_v45  ;;  %v704_v50 = vmax.f32 %v2244_v41, %v2248_v48  ;;  %v689_v51 = vpop.f32.mrb[7].mxu1  ;;  %v2453_v41 = vld [vmem:[#allocation7 + $0x170] ss:$8 sps:$4 sm:$0xff]  }
 0x2d8   :  { %v712_v52 = vadd.f32 %v2069_v44, %v701_v47  ;;  %v702_v53 = vmax.f32 %v673_v42, %v689_v51  ;;  %v2456_v42 = vld [vmem:[#allocation8] sm:$0xff]   ;;  %v2464_v48 = vld [vmem:[#allocation11 + $0xa0] ss:$8 sps:$4 sm:$0xff]  }
 0x2d9   :  { %v715_v54 = vadd.f32 %v2069_v44, %v704_v50  ;;  %v718_v56 = vmax.f32 %v714_v49, 0.0  ;;  %v2463_v45 = vld [vmem:[#allocation11 + $0x94] ss:$8 sps:$4 sm:$0xff]   ;;  %v2466_v47 = vld [vmem:[#allocation11 + $0xa4] ss:$8 sps:$4 sm:$0xff]  }
 0x2da   :  { %v713_v55 = vadd.f32 %v2069_v44, %v702_v53  ;;  %v716_v58 = vmax.f32 %v712_v52, 0.0  ;;  %v2460_v44 = vld [vmem:[#allocation11 + $0x84] ss:$8 sps:$4 sm:$0xff]   ;;  %v2469_v49 = vld [vmem:[#allocation11 + $0xb4] ss:$8 sps:$4 sm:$0xff]  }
 0x2db   :  { %v719_v57 = vmax.f32 %v715_v54, 0.0  ;;  %1418 = vmatprep.subr.bf16.mxu0 %v2460_v44  ;;  %v2467_v50 = vld [vmem:[#allocation11 + $0xb0] ss:$8 sps:$4 sm:$0xff]  }
 0x2dc   :  { %v717_v59 = vmax.f32 %v713_v55, 0.0  ;;  %1419 = vmatpush1.bf16.msra.mxu0 %v2458_v43  ;;  %v2807_v43 = vmov 0.0  }
 0x2dd   :  { %v3128_v60 = vpack.c.bf16 %v719_v57, %v718_v56  ;;  %1420 = vmatprep.subr.bf16.mxu0 %v2463_v45 }
 0x2de   :  { %v720_v61 = vpack.c.bf16 %v717_v59, %v716_v58 }
 0x2df   :  { %v1058_v62 = vrot.slane %v3128_v60, 1  ;;  %v763_v1 = vshll.u32 %v3128_v60, 16  ;;  %v767_v13 = vshrl.u32 %v3128_v60, 16 }
 0x2e0   :  { %v758_v63 = vshll.u32 %v720_v61, 16  ;;  %v1057_v2 = vrot.slane %v720_v61, 1  ;;  %v756_v3 = vshrl.u32 %v720_v61, 16  ;;  %1421 = vmatpush1.bf16.msra.mxu0 %v2461_v46 }
 0x2e1   :  { %v765_v8 = vrot.slane %v763_v1, 1  ;;  %1422 = vmatprep.subr.bf16.mxu0 %v2466_v47 }
 0x2e2   :  { %v760_v4 = vrot.slane %v758_v63, 1  ;;  %v3135_v5 = vsel %vm451_vm3, %v1057_v2, %v1058_v62 }
 0x2e3   :  { %v769_v15 = vor.u32 %v767_v13, %v765_v8 }
 0x2e4   :  { %v761_v7 = vor.u32 %v760_v4, %v756_v3  ;;  %1423 = vmatpush1.bf16.msra.mxu0 %v2464_v48  ;;  %v2457_v3 = vld [vmem:[#allocation8 + $0x8] sm:$0xff]   ;;  %v2472_v4 = vld [vmem:[#allocation11 + $0xc4] ss:$8 sps:$4 sm:$0xff]   ;;  %v2809_v48 = vmov 65535  }
 0x2e5   :  { %1424 = vmatprep.subr.bf16.mxu0 %v2469_v49  ;;  %v1599_v49 = vsel %vm451_vm3, 4294967295, %v2809_v48 }
 0x2e6   :  { %v766_v10 = vsel %vm198_vm1, %v761_v7, %v765_v8  ;;  %v2473_v7 = vld [vmem:[#allocation11 + $0xd0] ss:$8 sps:$4 sm:$0xff]   ;;  %v2478_v8 = vld [vmem:[#allocation11 + $0xe4] ss:$8 sps:$4 sm:$0xff]  }
 0x2e7   :  { %885 = vmatmul.mubr.bf16.vlgmr.msra.gmra.mrb[8].mxu1 %v766_v10  ;;  %v2481_v10 = vld [vmem:[#allocation11 + $0xf4] ss:$8 sps:$4 sm:$0xff]  }
 0x2e8   :  { %986 = vmatpush1.bf16.msra.mxu1 %v2408_v6  ;;  %894 = vmatprep.mubr.bf16.mxu1 %v2806_v0  ;;  %v2475_v6 = vld [vmem:[#allocation11 + $0xd4] ss:$8 sps:$4 sm:$0xff]  }
 0x2e9   :  { %987 = vmatprep.subr.bf16.mxu1 %v2413_v9  ;;  %1425 = vmatpush1.bf16.msra.mxu0 %v2467_v50  ;;  %v2476_v9 = vld [vmem:[#allocation11 + $0xe0] ss:$8 sps:$4 sm:$0xff]  }
 0x2ea   :  { %1426 = vmatprep.subr.bf16.mxu0 %v2472_v4  ;;  %v2507_v4 = vld [vmem:[%s3222_s10] sm:$0xff]  }
 0x2ec   :  { %988 = vmatpush1.bf16.msra.mxu1 %v2411_v11  ;;  %v2479_v11 = vld [vmem:[#allocation11 + $0xf0] ss:$8 sps:$4 sm:$0xff]  }
 0x2ed   :  { %989 = vmatprep.subr.bf16.mxu1 %v2416_v12  ;;  %v2484_v12 = vld [vmem:[#allocation11 + $0x4] ss:$8 sps:$4 sm:$0xff]  }
 0x2ef   :  { %895 = vmatmul.mubr.bf16.gmra.mrb[12].mxu1 %v769_v15  ;;  %v2122_v15 = vld [vmem:[#allocation10] ss:$0 sm:$0xff] }
 0x2f0   :  { %990 = vmatpush1.bf16.msra.mxu1 %v2414_v14  ;;  %1017 = vmatprep.mubr.bf16.mxu1 %v2806_v0 }
 0x2f1   :  { %991 = vmatprep.subr.bf16.mxu1 %v2419_v16 }
 0x2f4   :  { %992 = vmatpush1.bf16.msra.mxu1 %v2417_v17 }
 0x2f5   :  { %993 = vmatprep.subr.bf16.mxu1 %v2422_v18 }
 0x2f8   :  { %994 = vmatpush1.bf16.msra.mxu1 %v2420_v19 }
 0x2f9   :  { %995 = vmatprep.subr.bf16.mxu1 %v2425_v20 }
 0x2fc   :  { %996 = vmatpush1.bf16.msra.mxu1 %v2423_v21 }
 0x2fd   :  { %997 = vmatprep.subr.bf16.mxu1 %v2428_v22 }
 0x300   :  { %998 = vmatpush1.bf16.msra.mxu1 %v2426_v23 }
 0x301   :  { %999 = vmatprep.subr.bf16.mxu1 %v2431_v24 }
 0x304   :  { %1000 = vmatpush1.bf16.msra.mxu1 %v2429_v25 }
 0x305   :  { %1142 = vmatprep.subr.bf16.mxu1 %v2434_v26 }
 0x307   :  { %1018 = vmatmul.mubr.bf16.vlgmr.msra.gmra.mrb[8].mxu1 %v720_v61 }
 0x308   :  { %1143 = vmatpush1.bf16.msra.mxu1 %v2432_v27  ;;  %1027 = vmatprep.mubr.bf16.mxu1 %v2806_v0 }
 0x309   :  { %1144 = vmatprep.subr.bf16.mxu1 %v2437_v28  ;;  %v2482_v28 = vld [vmem:[#allocation11] ss:$8 sps:$4 sm:$0xff]  }
 0x30c   :  { %1145 = vmatpush1.bf16.msra.mxu1 %v2435_v29 }
 0x30d   :  { %1146 = vmatprep.subr.bf16.mxu1 %v2440_v30  ;;  %v2487_v30 = vld [vmem:[#allocation11 + $0x14] ss:$8 sps:$4 sm:$0xff]  }
 0x30f   :  { %1028 = vmatmul.mubr.bf16.gmra.mrb[12].mxu1 %v3128_v60 }
 0x310   :  { %1147 = vmatpush1.bf16.msra.mxu1 %v2438_v31  ;;  %1174 = vmatprep.mubr.bf16.mxu1 %v2806_v0  ;;  %v2485_v31 = vld [vmem:[#allocation11 + $0x10] ss:$8 sps:$4 sm:$0xff]  }
 0x311   :  { %1148 = vmatprep.subr.bf16.mxu1 %v2443_v32  ;;  %v2490_v32 = vld [vmem:[#allocation11 + $0x24] ss:$8 sps:$4 sm:$0xff]  }
 0x314   :  { %1149 = vmatpush1.bf16.msra.mxu1 %v2441_v33  ;;  %v2488_v33 = vld [vmem:[#allocation11 + $0x20] ss:$8 sps:$4 sm:$0xff]  }
 0x315   :  { %1150 = vmatprep.subr.bf16.mxu1 %v2446_v34  ;;  %v2493_v34 = vld [vmem:[#allocation11 + $0x34] ss:$8 sps:$4 sm:$0xff]  }
 0x318   :  { %1151 = vmatpush1.bf16.msra.mxu1 %v2444_v35  ;;  %v2491_v35 = vld [vmem:[#allocation11 + $0x30] ss:$8 sps:$4 sm:$0xff]  }
 0x319   :  { %1152 = vmatprep.subr.bf16.mxu1 %v2449_v36  ;;  %v2496_v36 = vld [vmem:[#allocation11 + $0x44] ss:$8 sps:$4 sm:$0xff]  }
 0x31c   :  { %1153 = vmatpush1.bf16.msra.mxu1 %v2447_v37  ;;  %v2494_v37 = vld [vmem:[#allocation11 + $0x40] ss:$8 sps:$4 sm:$0xff]  }
 0x31d   :  { %1154 = vmatprep.subr.bf16.mxu1 %v2452_v38  ;;  %v2499_v38 = vld [vmem:[#allocation11 + $0x54] ss:$8 sps:$4 sm:$0xff]  }
 0x320   :  { %1155 = vmatpush1.bf16.msra.mxu1 %v2450_v39  ;;  %v2497_v39 = vld [vmem:[#allocation11 + $0x50] ss:$8 sps:$4 sm:$0xff]  }
 0x321   :  { %1156 = vmatprep.subr.bf16.mxu1 %v2455_v40  ;;  %v2502_v40 = vld [vmem:[#allocation11 + $0x64] ss:$8 sps:$4 sm:$0xff]  }
 0x324   :  { %1157 = vmatpush1.bf16.msra.mxu1 %v2453_v41  ;;  %v2505_v41 = vld [vmem:[#allocation11 + $0x74] ss:$8 sps:$4 sm:$0xff]  }
 0x327   :  { %1175 = vmatmul.mubr.bf16.vlgmr.msra.gmra.mrb[8].mxu1 %v3135_v5  ;;  %v2470_v5 = vld [vmem:[#allocation11 + $0xc0] ss:$8 sps:$4 sm:$0xff]  }
 0x328   :  { %1184 = vmatprep.mubr.bf16.mxu1 %v2806_v0  ;;  %1427 = vmatpush1.bf16.msra.mxu0 %v2470_v5  ;;  %v2509_v5 = vld [vmem:[#allocation14] sm:$0xff]  }
 0x329   :  { %1428 = vmatprep.subr.bf16.mxu0 %v2475_v6  ;;  %v2510_v6 = vld [vmem:[#allocation14 + $0x48] sm:$0xff]  }
 0x32c   :  { %1429 = vmatpush1.bf16.msra.mxu0 %v2473_v7  ;;  %v2511_v7 = vld [vmem:[#allocation14 + $0x8] sm:$0xff]  }
 0x32d   :  { %1430 = vmatprep.subr.bf16.mxu0 %v2478_v8  ;;  %v2512_v8 = vld [vmem:[#allocation14 + $0x50] sm:$0xff]  }
 0x32f   :  { %1185 = vmatmul.mubr.bf16.gmra.mrb[12].mxu1 %v1058_v62 }
 0x330   :  { %2253 = vmatprep.mubr.msk.bf16.mxu1 %vm1223_vm6, %v2456_v42  ;;  %1431 = vmatpush1.bf16.msra.mxu0 %v2476_v9  ;;  %v2503_v42 = vld [vmem:[#allocation11 + $0x70] ss:$8 sps:$4 sm:$0xff]  }
 0x331   :  { %1432 = vmatprep.subr.bf16.mxu0 %v2481_v10  ;;  %v2513_v9 = vld [vmem:[#allocation14 + $0x10] sm:$0xff]   ;;  %v2514_v10 = vld [vmem:[#allocation14 + $0x58] sm:$0xff]  }
 0x334   :  { %1433 = vmatpush1.bf16.msra.mxu0 %v2479_v11  ;;  %v2515_v11 = vld [vmem:[#allocation14 + $0x18] sm:$0xff]  }
 0x335   :  { %1541 = vmatprep.subr.bf16.mxu0 %v2484_v12  ;;  %v2516_v12 = vld [vmem:[#allocation14 + $0x60] sm:$0xff]  }
 0x3fa   :  { %v1176_v51 = vpop.f32.mrb[8].mxu1 }
 0x3fb   :  { %v1178_v52 = vpop.f32.mrb[9].mxu1 }
 0x3fc   :  { %v1203_v53 = vmax.f32 %v1176_v51, %v1178_v52  ;;  %v1180_v54 = vpop.f32.mrb[10].mxu1  ;;  %v1600_v52 = vsel %vm1598_vm8, %v1599_v49, 0 }
 0x3fd   :  { %v1182_v55 = vpop.f32.mrb[11].mxu1 }
 0x3fe   :  { %v1204_v56 = vmax.f32 %v1180_v54, %v1182_v55  ;;  %v2506_v55 = vld [vmem:[%s3220_s8] sm:$0xff]  }
 0x400   :  { %v1211_v57 = vpack.c.bf16 %v1204_v56, %v1203_v53 }
 0x402   :  { %v1186_v58 = vpop.f32.mrb[12].mxu1  ;;  %2249 = vmatprep.subr.bf16.mxu1 %v1211_v57 }
 0x403   :  { %v1188_v59 = vpop.f32.mrb[13].mxu1  ;;  %2250 = vmatpush3.bf16.msra.mxu1 %v1211_v57 }
 0x404   :  { %v1205_v60 = vmax.f32 %v1186_v58, %v1188_v59  ;;  %v1190_v61 = vpop.f32.mrb[14].mxu1  ;;  %v2157_v59 = vld [vmem:[#allocation13] ss:$0 sm:$0xff] }
 0x405   :  { %v1192_v62 = vpop.f32.mrb[15].mxu1 }
 0x406   :  { %v1206_v63 = vmax.f32 %v1190_v61, %v1192_v62 }
 0x408   :  { %v1212_v1 = vpack.c.bf16 %v1206_v63, %v1205_v60 }
 0x40a   :  { %2342 = vmatprep.subr.msk.bf16.mxu1 %vm451_vm3, %v1212_v1  ;;  %v1232_v2 = vsel %vm451_vm3, %v1212_v1, 0 }
 0x40b   :  { %2252 = vmatpush3.bf16.msra.mxu1 %v1232_v2  ;;  %v2508_v2 = vld [vmem:[#allocation14 + $0x40] sm:$0xff]  }
 0x40c   :  { %2257 = vmatprep.subr.bf16.mxu1 %v2807_v43 }
 0x40e   :  { %2254 = vmatmul.mubr.msk.bf16.vlgmr.msra.gmra.mrb[16].mxu1 %vm1223_vm6, %v2457_v3 }
 0x40f   :  { %2259 = vmatprep.mubr.msk.bf16.mxu1 %vm2808_vm7, %v2807_v43 }
 0x4e1   :  { %v2255_v13 = vpop.f32.mrb[16].mxu1 }
 0x4e2   :  { %v1268_v14 = vpop.f32.mrb[17].mxu1 }
 0x4e3   :  { %v1283_v16 = vmax.f32 %v1268_v14, %v2255_v13  ;;  %v2256_v17 = vpop.f32.mrb[18].mxu1  ;;  %v2517_v13 = vld [vmem:[#allocation14 + $0x20] sm:$0xff]   ;;  %v2518_v14 = vld [vmem:[#allocation14 + $0x68] sm:$0xff]  }
 0x4e4   :  { %v1271_v18 = vpop.f32.mrb[19].mxu1 }
 0x4e5   :  { %v1292_v19 = vadd.f32 %v2122_v15, %v1283_v16  ;;  %v1284_v20 = vmax.f32 %v1271_v18, %v2256_v17  ;;  %v2520_v16 = vld [vmem:[#allocation14 + $0x70] sm:$0xff]   ;;  %v2522_v18 = vld [vmem:[#allocation14 + $0x78] sm:$0xff]  }
 0x4e6   :  { %v2521_v17 = vld [vmem:[#allocation14 + $0x30] sm:$0xff]  }
 0x4e7   :  { %v1293_v21 = vadd.f32 %v2122_v15, %v1284_v20  ;;  %v1294_v22 = vmax.f32 %v1292_v19, 0.0  ;;  %v2519_v15 = vld [vmem:[#allocation14 + $0x28] sm:$0xff]   ;;  %v2523_v19 = vld [vmem:[#allocation14 + $0x38] sm:$0xff]  }
 0x4e8   :  { %v2524_v20 = vld [vmem:[%s3225_s13] sm:$0xff]  }
 0x4e9   :  { %v1295_v23 = vmax.f32 %v1293_v21, 0.0  ;;  %v2525_v21 = vld [vmem:[%s3225_s13 + $0x8] sm:$0xff]  }
 0x4eb   :  { %v1296_v24 = vpack.c.bf16 %v1295_v23, %v1294_v22  ;;  %v2526_v22 = vld [vmem:[%s3225_s13 + $0x10] sm:$0xff]   ;;  %v2527_v23 = vld [vmem:[%s3225_s13 + $0x18] sm:$0xff]  }
 0x4ed   :  { %v1333_v25 = vshll.u32 %v1296_v24, 16  ;;  %v1331_v26 = vshrl.u32 %v1296_v24, 16 }
 0x4ef   :  { %v1335_v27 = vrot.slane %v1333_v25, 1  ;;  %v2529_v25 = vld [vmem:[%s3225_s13 + $0x28] sm:$0xff]  }
 0x4f1   :  { %v1336_v29 = vor.u32 %v1335_v27, %v1331_v26 }
 0x4f3   :  { %1451 = vmatmul.mubr.bf16.vlgmr.msra.gmra.mrb[16].mxu0 %v1336_v29 }
 0x4f4   :  { %1542 = vmatpush1.bf16.msra.mxu0 %v2482_v28  ;;  %1573 = vmatprep.mubr.bf16.mxu0 %v2806_v0  ;;  %v2500_v0 = vld [vmem:[#allocation11 + $0x60] ss:$8 sps:$4 sm:$0xff]  }
 0x4f5   :  { %1543 = vmatprep.subr.bf16.mxu0 %v2487_v30 }
 0x4f8   :  { %1544 = vmatpush1.bf16.msra.mxu0 %v2485_v31 }
 0x4f9   :  { %1545 = vmatprep.subr.bf16.mxu0 %v2490_v32  ;;  %v2530_v32 = vld [vmem:[%s3225_s13 + $0x30] sm:$0xff]  }
 0x4fc   :  { %1546 = vmatpush1.bf16.msra.mxu0 %v2488_v33  ;;  %v2531_v33 = vld [vmem:[%s3225_s13 + $0x38] sm:$0xff]  }
 0x4fd   :  { %1547 = vmatprep.subr.bf16.mxu0 %v2493_v34 }
 0x500   :  { %1548 = vmatpush1.bf16.msra.mxu0 %v2491_v35  ;;  %v2160_v35 = vld [vmem:[#allocation16] ss:$0 sm:$0xff] }
 0x501   :  { %1549 = vmatprep.subr.bf16.mxu0 %v2496_v36 }
 0x504   :  { %1550 = vmatpush1.bf16.msra.mxu0 %v2494_v37 }
 0x505   :  { %1551 = vmatprep.subr.bf16.mxu0 %v2499_v38 }
 0x508   :  { %1552 = vmatpush1.bf16.msra.mxu0 %v2497_v39 }
 0x509   :  { %1553 = vmatprep.subr.bf16.mxu0 %v2502_v40 }
 0x50c   :  { %1554 = vmatpush1.bf16.msra.mxu0 %v2500_v0 }
 0x50d   :  { %1555 = vmatprep.subr.bf16.mxu0 %v2505_v41 }
 0x510   :  { %1556 = vmatpush1.bf16.msra.mxu0 %v2503_v42  ;;  %v2177_v42 = vld [vmem:[#allocation17] ss:$0 sm:$0xff] }
 0x511   :  { %2269 = vmatprep.subr.bf16.mxu0 %v2807_v43 }
 0x513   :  { %1574 = vmatmul.mubr.bf16.vlgmr.msra.gmra.mrb[16].mxu0 %v1296_v24  ;;  %v2528_v24 = vld [vmem:[%s3225_s13 + $0x20] sm:$0xff]   ;;  %s2810_s13 = smov [#allocation19]  }
 0x514   :  { %2285 = vmatprep.mubr.msk.bf16.mxu0 %vm2808_vm7, %v2807_v43  ;;  %2270 = vmatpush3.bf16.msra.mxu0 %v2524_v20  ;;  %s2020_s22 = sshll.u32 %s2810_s13, 4  ;;  %s2021_s22 = int_to_ptr.vmem [resolvable:$true] %s2020_s22 }
 0x515   :  { %2271 = vmatprep.subr.bf16.mxu0 %v2807_v43  ;;  %s2756_s0 = scalar_lea.vmem %s2021_s22, 32  ;;  %p2761_p11 = scmp.lt.s32.totalorder %s2021_s22, %s2021_s22 }
 0x516   :  { %p2757_p10 = scmp.ne.s32.totalorder %s2021_s22, %s2756_s0  ;;  %p2762_p12 = scmp.lt.s32.totalorder %s2756_s0, %s2756_s0 }
 0x518   :  { %2272 = vmatpush3.bf16.msra.mxu0 %v2525_v21  ;;  %p2763_p13 = por %p2762_p12, %p2761_p11 }
 0x519   :  { %2273 = vmatprep.subr.bf16.mxu0 %v2807_v43 }
 0x51a   :  { %p2764_p0 = pnand %p2763_p13, %p2757_p10 }
 0x51c   :  { %2274 = vmatpush3.bf16.msra.mxu0 %v2526_v22 }
 0x51d   :  { %2275 = vmatprep.subr.bf16.mxu0 %v2807_v43 }
 0x520   :  { %2276 = vmatpush3.bf16.msra.mxu0 %v2527_v23 }
 0x521   :  { %2277 = vmatprep.subr.bf16.mxu0 %v2807_v43 }
 0x524   :  { %2278 = vmatpush3.bf16.msra.mxu0 %v2528_v24 }
 0x525   :  { %2279 = vmatprep.subr.bf16.mxu0 %v2807_v43 }
 0x528   :  { %2280 = vmatpush3.bf16.msra.mxu0 %v2529_v25 }
 0x529   :  { %2281 = vmatprep.subr.bf16.mxu0 %v2807_v43 }
 0x52c   :  { %2282 = vmatpush3.bf16.msra.mxu0 %v2530_v32 }
 0x52d   :  { %2283 = vmatprep.subr.bf16.mxu0 %v2807_v43 }
 0x530   :  { %2284 = vmatpush3.bf16.msra.mxu0 %v2531_v33 }
 0x5e6   :  { %v1575_v44 = vpop.f32.mrb[16].mxu0 }
 0x5e7   :  { %v1577_v45 = vpop.f32.mrb[17].mxu0 }
 0x5e8   :  { %v1584_v46 = vmax.f32 %v1575_v44, %v1577_v45  ;;  %v1579_v47 = vpop.f32.mrb[18].mxu0 }
 0x5e9   :  { %v1581_v50 = vpop.f32.mrb[19].mxu0 }
 0x5ea   :  { %v1585_v51 = vmax.f32 %v1579_v47, %v1581_v50 }
 0x5ec   :  { %v1588_v53 = vpack.c.bf16 %v1585_v51, %v1584_v46 }
 0x5ee   :  { %v1602_v54 = vand.u32 %v1600_v52, %v1588_v53 }
 0x5f0   :  { %2258 = vmatpush3.bf16.msra.mxu1 %v1602_v54 }
 0x5f1   :  { %2263 = vmatprep.subr.bf16.mxu1 %v2807_v43 }
 0x5f3   :  { %2260 = vmatmul.mubr.msk.bf16.vlgmr.msra.gmra.mrb[20].mxu1 %vm1594_vm9, %v2506_v55 }
 0x5f4   :  { %2265 = vmatprep.mubr.msk.bf16.mxu1 %vm2808_vm7, %v2807_v43 }
 0x6c6   :  { %v1638_v56 = vpop.f32.mrb[20].mxu1 }
 0x6c7   :  { %v2261_v57 = vpop.f32.mrb[21].mxu1 }
 0x6c8   :  { %v1641_v58 = vpop.f32.mrb[22].mxu1 }
 0x6c9   :  { %v1645_v60 = vmax.f32 %v1638_v56, %v1641_v58  ;;  %v2262_v61 = vpop.f32.mrb[23].mxu1 }
 0x6cb   :  { %v1653_v62 = vadd.f32 %v2157_v59, %v1645_v60 }
 0x6cd   :  { %v1654_v63 = vmax.f32 %v1653_v62, 0.0 }
 0x6cf   :  { %v1657_v1 = vpack.c.bf16 %v1654_v63, %v1654_v63 }
 0x6d1   :  { %v1669_v3 = vsel %vm1667_vm10, %v1657_v1, 0 }
 0x6d2   :  { %2264 = vmatpush3.bf16.msra.mxu1 %v1669_v3 }
 0x6d3   :  { %2202 = vmatprep.subr.bf16.mxu1 %v2508_v2 }
 0x6d5   :  { %2266 = vmatmul.mubr.msk.bf16.vlgmr.msra.gmra.mrb[24].mxu1 %vm1663_vm11, %v2507_v4 }
 0x6d6   :  { %2203 = vmatpush3.bf16.msra.mxu1 %v2509_v5 }
 0x6d7   :  { %2204 = vmatprep.subr.bf16.mxu1 %v2510_v6 }
 0x6da   :  { %2205 = vmatpush3.bf16.msra.mxu1 %v2511_v7 }
 0x6db   :  { %2206 = vmatprep.subr.bf16.mxu1 %v2512_v8 }
 0x6de   :  { %2207 = vmatpush3.bf16.msra.mxu1 %v2513_v9 }
 0x6df   :  { %2208 = vmatprep.subr.bf16.mxu1 %v2514_v10 }
 0x6e2   :  { %2209 = vmatpush3.bf16.msra.mxu1 %v2515_v11 }
 0x6e3   :  { %2210 = vmatprep.subr.bf16.mxu1 %v2516_v12 }
 0x6e6   :  { %2211 = vmatpush3.bf16.msra.mxu1 %v2517_v13 }
 0x6e7   :  { %2212 = vmatprep.subr.bf16.mxu1 %v2518_v14 }
 0x6ea   :  { %2213 = vmatpush3.bf16.msra.mxu1 %v2519_v15 }
 0x6eb   :  { %2214 = vmatprep.subr.bf16.mxu1 %v2520_v16 }
 0x6ee   :  { %2215 = vmatpush3.bf16.msra.mxu1 %v2521_v17 }
 0x6ef   :  { %2216 = vmatprep.subr.bf16.mxu1 %v2522_v18 }
 0x6f2   :  { %2217 = vmatpush3.bf16.msra.mxu1 %v2523_v19 }
 0x7a8   :  { %v1705_v26 = vpop.f32.mrb[24].mxu1 }
 0x7a9   :  { %v2267_v27 = vpop.f32.mrb[25].mxu1  ;;  %v1712_v31 = vpack.c.bf16 %v1705_v26, %v1705_v26 }
 0x7aa   :  { %v1708_v28 = vpop.f32.mrb[26].mxu1 }
 0x7ab   :  { %v1713_v29 = vpack.c.bf16 %v1708_v28, %v1708_v28  ;;  %v2268_v30 = vpop.f32.mrb[27].mxu1 }
 0x7ad   :  { %1881 = vmatprep.mubr.bf16.mxu1 %v1713_v29 }
 0x7ae   :  { %1882 = vmatmul.mubr.bf16.vlgmr.msra.gmra.mrb[28].mxu1 %v1712_v31 }
 0x881   :  { %v2218_v34 = vpop.f32.mrb[28].mxu1 }
 0x882   :  { %v2219_v36 = vpop.f32.mrb[29].mxu1 }
 0x883   :  { %v2220_v37 = vadd.f32 %v2219_v36, %v2218_v34  ;;  %v2221_v38 = vpop.f32.mrb[30].mxu1 }
 0x884   :  { %v2222_v39 = vpop.f32.mrb[31].mxu1 }
 0x885   :  { %v1884_v40 = vadd.f32 %v2220_v37, %v2160_v35 }
 0x887   :  { %v1889_v0 = vmax.f32 %v1884_v40, 0.0 }
 0x889   :  { %v1890_v41 = vpack.c.bf16 %v1889_v0, %v1889_v0 }
 0x88b   :  { %2286 = vmatmul.mubr.bf16.vlgmr.msra.gmra.mrb[20].mxu0 %v1890_v41 }
 0x95e   :  { %v1996_v44 = vpop.f32.mrb[20].mxu0 }
 0x95f   :  { %v1997_v45 = vadd.f32 %v2177_v42, %v1996_v44  ;;  %v2287_v46 = vpop.f32.mrb[21].mxu0 }
 0x960   :  { %v1999_v43 = vpop.f32.mrb[22].mxu0 }
 0x961   :  { %2002 = vmax.xlane.f32.xlu0 %v1997_v45  ;;  %v2288_v47 = vpop.f32.mrb[23].mxu0 }
 0x9ee   :  { %v2003_v48 = vpop.xlane.xlu0 %2002 }
 0x9ef   :  { %v2004_v49 = vsub.f32 %v1997_v45, %v2003_v48 }
 0x9f1   :  { %v2005_v50 = vmul.f32 1.442695, %v2004_v49 }
 0x9f3   :  { %2532 = vpow2.f32 %v2005_v50 }
 0x9fd   :  { %v2533_v51 = vpop.eup %2532 }
 0x9fe   :  { %2007 = vadd.xlane.f32.xlu0 %v2533_v51 }
 0xa8b   :  { %v2008_v52 = vpop.xlane.xlu0 %2007 }
 0xa8c   :  { %2534 = vlog2.f32 %v2008_v52 }
 0xa96   :  { %v2535_v53 = vpop.eup %2534 }
 0xa97   :  { %v2010_v54 = vmul.f32 0.6931472, %v2535_v53 }
 0xa99   :  { %v2011_v55 = vadd.f32 %v2010_v54, %v2003_v48 }
 0xa9b   :  { %v2012_v56 = vsub.f32 %v1997_v45, %v2011_v55 }
 0xa9d   :  { %2013 = vst [vmem:[#allocation19] sm:$0x3] %v2012_v56 }
 0xa9e   :  { %2767 = shalt.err (!%p2764_p0)
}
 0xa9f   :  { %s2768_s29 = scalar_lea.hbm %s3227_s15, 32 }
 0xaa0   :  { %p2769_p1 = scmp.ne.s32.totalorder %s3227_s15, %s2768_s29  ;;  %p2772_p2 = scmp.lt.u32.totalorder %s2768_s29, %s3227_s15 }
 0xaa2   :  { %p2774_p3 = pnand %p2772_p2, %p2769_p1 }
 0xaa4   :  { %2777 = shalt.err (!%p2774_p3)
}
 0xaa5   :  { %2023 = dma.vmem_to_hbm [thread:$0]  %s2021_s22, 32, %s3227_s15, [#allocation4]  }
 0xaa6   :  { %2790 = dma.done.wait [#allocation4], 32  }
 0xaa7   :  { %2791 = vsyncadd [#allocation4], 4294967264 }
 0xaa8   :  { %2027 = vsyncpa [#allocation3], 1 }
 0xaa9   :  { %2028 = vsyncpa [#allocation6], 1 }
 0xaaa   :  { %2029 = vsyncpa [#allocation9], 1 }
 0xaab   :  { %2030 = vsyncpa [#allocation12], 1 }
 0xaac   :  { %2031 = vsyncpa [#allocation15], 1 }
 0xaad   :  { %2032 = vsyncpa [#allocation18], 1 }
 0xaae   :  { %2033 = vsyncpa [#allocation4], 1 }

</bundles_post_ra>
